<compile_context>
chip_gen: v5e
topology: v5e:2x2
jax: 0.10.0
libtpu: 0.0.40
codegen_flags: <defaults>
</compile_context>

<pallas_src>
import numpy as np
import jax
import jax.numpy as jnp
from jax.experimental import pallas as pl
from jax.experimental.pallas import tpu as pltpu


# --------------------------- Fused Pallas kernel -----------------------------

def _fused_gnn_kernel(
        # inputs
        x_ref, ea_ref, g_ref, s_ref, pool_ref,
        c1w1, c1b1, c1w2, c1b2, c1root, c1bias,
        c2w1, c2b1, c2w2, c2b2, c2root, c2bias,
        f1w, f1b, f2w, f2b,
        # output
        out_ref,
        # scratch
        acc1_ref, acc2_ref, x1_ref):
    """Entire Net forward in one kernel.

    grid = (layer, edge_tile):
      layer 0 : NNConv(Cin->16, mean) + ELU, result kept in VMEM scratch x1_ref
      layer 1 : NNConv(16->32, mean) + ELU, then pool/fc1/ELU/fc2/log_softmax
    The edge_tile axis is a reduction: per-tile scattered messages accumulate
    into an f32 VMEM accumulator (init at k==0, finalize at k==last).
    """
    layer = pl.program_id(0)
    k = pl.program_id(1)
    k_last = pl.num_programs(1) - 1

    def elu(v):
        return jnp.where(v > 0.0, v, jnp.exp(v) - 1.0)       # ELU(alpha=1)

    def edge_messages(w1, b1, w2, b2, xs, cin, cout):
        # Edge net Linear(1,10) -> ReLU -> Linear(10, cin*cout).  The K=1
        # contraction is a broadcast multiply (keep it off the MXU).
        h = jnp.maximum(ea_ref[...] * w1[...] + b1[...], 0.0)                       # (te, 10)
        ew = jnp.dot(h, w2[...], preferred_element_type=jnp.float32) + b2[...]      # (te, cin*cout)
        # m[e, o] = sum_c xs[e, c] * W_e[c, o], W_e = ew[e].reshape(cin, cout).
        m = xs[:, 0:1] * ew[:, 0:cout]
        for c in range(1, cin):
            m = m + xs[:, c:c + 1] * ew[:, c * cout:(c + 1) * cout]
        return m

    def scatter_mean(m):
        # s holds one_hot(dst) * (1/deg(dst)); contract over the edge tile.
        return jax.lax.dot_general(
            s_ref[...], m, dimension_numbers=(((0,), (0,)), ((), ())),
            preferred_element_type=jnp.float32)

    # -------- layer 0: NNConv(num_features -> 16) + ELU -> x1_ref ------------
    @pl.when(layer == 0)
    def _layer0():
        @pl.when(k == 0)
        def _():
            acc1_ref[...] = jnp.zeros_like(acc1_ref)

        cin = x_ref.shape[1]
        cout = c1root.shape[1]
        xs = jnp.dot(g_ref[...], x_ref[...], preferred_element_type=jnp.float32)
        acc1_ref[...] += scatter_mean(
            edge_messages(c1w1, c1b1, c1w2, c1b2, xs, cin, cout))

        @pl.when(k == k_last)
        def _():
            y = acc1_ref[...] + jnp.dot(
                x_ref[...], c1root[...],
                preferred_element_type=jnp.float32) + c1bias[...]
            x1_ref[...] = elu(y)

    # -------- layer 1: NNConv(16 -> 32) + ELU + fused head --------------------
    @pl.when(layer == 1)
    def _layer1():
        @pl.when(k == 0)
        def _():
            acc2_ref[...] = jnp.zeros_like(acc2_ref)

        cin = x1_ref.shape[1]
        cout = c2root.shape[1]
        xs = jnp.dot(g_ref[...], x1_ref[...], preferred_element_type=jnp.float32)
        acc2_ref[...] += scatter_mean(
            edge_messages(c2w1, c2b1, c2w2, c2b2, xs, cin, cout))

        @pl.when(k == k_last)
        def _():
            x2 = elu(acc2_ref[...] + jnp.dot(
                x1_ref[...], c2root[...],
                preferred_element_type=jnp.float32) + c2bias[...])
            gp = jnp.dot(pool_ref[...], x2, preferred_element_type=jnp.float32)
            h = elu(jnp.dot(gp, f1w[...], preferred_element_type=jnp.float32) + f1b[...])
            logits = jnp.dot(h, f2w[...], preferred_element_type=jnp.float32) + f2b[...]
            z = logits - jnp.max(logits, axis=1, keepdims=True)
            out_ref[...] = z - jnp.log(jnp.sum(jnp.exp(z), axis=1, keepdims=True))


def gnn_forward(params, x, ea, gmat, smat_t, pool, *, te):
    """x:(N,Cin), ea:(E,1), gmat:(E,N) one-hot(src), smat_t:(E,N) one-hot(dst)/deg,
    pool:(B,N) one-hot(batch)/count.  Returns (B, num_classes) log-probs."""
    n, _ = x.shape
    e_pad = ea.shape[0]
    assert e_pad % te == 0
    b = pool.shape[0]
    c1out = params['c1_root'].shape[1]
    c2out = params['c2_root'].shape[1]
    ncls = params['fc2_w'].shape[1]

    def r2(v):  # biases as (1, k) rows
        return v.reshape(1, -1)

    weights = (
        params['c1_w1'], r2(params['c1_b1']), params['c1_w2'], r2(params['c1_b2']),
        params['c1_root'], r2(params['c1_bias']),
        params['c2_w1'], r2(params['c2_b1']), params['c2_w2'], r2(params['c2_b2']),
        params['c2_root'], r2(params['c2_bias']),
        params['fc1_w'], r2(params['fc1_b']), params['fc2_w'], r2(params['fc2_b']),
    )

    def const_spec(a):                       # VMEM-resident, same block every step
        return pl.BlockSpec(a.shape, lambda l, k: (0, 0))

    def edge_spec(width):                    # tiled along the edge (reduction) axis
        return pl.BlockSpec((te, width), lambda l, k: (k, 0))

    in_specs = ([const_spec(x), edge_spec(1), edge_spec(n), edge_spec(n),
                 const_spec(pool)]
                + [const_spec(w) for w in weights])

    return pl.pallas_call(
        _fused_gnn_kernel,
        out_shape=jax.ShapeDtypeStruct((b, ncls), jnp.float32),
        grid=(2, e_pad // te),
        in_specs=in_specs,
        out_specs=pl.BlockSpec((b, ncls), lambda l, k: (0, 0)),
        scratch_shapes=[
            pltpu.VMEM((n, c1out), jnp.float32),   # conv1 message accumulator
            pltpu.VMEM((n, c2out), jnp.float32),   # conv2 message accumulator
            pltpu.VMEM((n, c1out), jnp.float32),   # ELU(conv1) node features
        ],
        compiler_params=pltpu.CompilerParams(
            dimension_semantics=("arbitrary", "arbitrary")),
    )(x, ea, gmat, smat_t, pool, *weights)


# ------------------------------- Glue ----------------------------------------

def build_structure(x, edge_attr, src, dst, batch, num_graphs, *, te):
    """Pad nodes/edges and build one-hot gather / scatter-mean / pool matrices."""
    n = x.shape[0]
    e = src.shape[0]
    n_pad = ((n + 7) // 8) * 8
    e_pad = ((e + te - 1) // te) * te

    x_p = jnp.pad(x, ((0, n_pad - n), (0, 0)))
    ea_p = jnp.pad(edge_attr, ((0, e_pad - e), (0, 0)))
    src_p = jnp.concatenate([src, -jnp.ones((e_pad - e,), jnp.int32)])
    dst_p = jnp.concatenate([dst, -jnp.ones((e_pad - e,), jnp.int32)])
    batch_p = jnp.concatenate([batch, -jnp.ones((n_pad - n,), jnp.int32)])

    gmat = jax.nn.one_hot(src_p, n_pad, dtype=jnp.float32)              # (E_pad, N_pad)
    deg = jnp.zeros((n_pad,), jnp.float32).at[dst].add(1.0)
    smat_t = jax.nn.one_hot(dst_p, n_pad, dtype=jnp.float32) \
        / jnp.maximum(deg, 1.0)[None, :]                                # (E_pad, N_pad)
    cnt = jnp.zeros((num_graphs,), jnp.float32).at[batch].add(1.0)
    pool = jax.nn.one_hot(batch_p, num_graphs, dtype=jnp.float32).T \
        / jnp.maximum(cnt, 1.0)[:, None]                                # (B, N_pad)
    return x_p, ea_p, gmat, smat_t, pool


# --------------------------- Parameters --------------------------------------

def init_params(key, num_features, num_classes):
    ks = iter(jax.random.split(key, 16))

    def lin(fan_in, fan_out):
        bound = float(1.0 / np.sqrt(fan_in))
        w = jax.random.uniform(next(ks), (fan_in, fan_out), jnp.float32, -bound, bound)
        b = jax.random.uniform(next(ks), (fan_out,), jnp.float32, -bound, bound)
        return w, b

    p = {}
    # conv1: NNConv(num_features -> 16); edge-net Linear(1,10)->ReLU->Linear(10, num_features*16)
    p['c1_w1'], p['c1_b1'] = lin(1, 10)
    p['c1_w2'], p['c1_b2'] = lin(10, num_features * 16)
    p['c1_root'], p['c1_bias'] = lin(num_features, 16)
    # conv2: NNConv(16 -> 32); edge-net Linear(1,10)->ReLU->Linear(10, 32*16)
    p['c2_w1'], p['c2_b1'] = lin(1, 10)
    p['c2_w2'], p['c2_b2'] = lin(10, 16 * 32)
    p['c2_root'], p['c2_bias'] = lin(16, 32)
    # head
    p['fc1_w'], p['fc1_b'] = lin(32, 64)
    p['fc2_w'], p['fc2_b'] = lin(64, num_classes)
    return p


# --------------------------- Pure-JAX reference -------------------------------

def reference_forward(params, x, edge_attr, src, dst, batch, num_graphs):
    def elu(v):
        return jnp.where(v > 0.0, v, jnp.exp(v) - 1.0)

    def nnconv(xn, w1, b1, w2, b2, root, bias):
        cin, cout = root.shape
        h = jnp.maximum(edge_attr @ w1 + b1, 0.0)
        ew = (h @ w2 + b2).reshape(-1, cin, cout)
        msg = jnp.einsum('ec,eco->eo', xn[src], ew)
        agg = jnp.zeros((xn.shape[0], cout), jnp.float32).at[dst].add(msg)
        deg = jnp.zeros((xn.shape[0],), jnp.float32).at[dst].add(1.0)
        agg = agg / jnp.maximum(deg, 1.0)[:, None]
        return agg + xn @ root + bias

    x1 = elu(nnconv(x, params['c1_w1'], params['c1_b1'], params['c1_w2'],
                    params['c1_b2'], params['c1_root'], params['c1_bias']))
    x2 = elu(nnconv(x1, params['c2_w1'], params['c2_b1'], params['c2_w2'],
                    params['c2_b2'], params['c2_root'], params['c2_bias']))
    cnt = jnp.zeros((num_graphs,), jnp.float32).at[batch].add(1.0)
    gp = jnp.zeros((num_graphs, x2.shape[1]), jnp.float32).at[batch].add(x2) \
        / jnp.maximum(cnt, 1.0)[:, None]
    h = elu(gp @ params['fc1_w'] + params['fc1_b'])
    logits = h @ params['fc2_w'] + params['fc2_b']
    return jax.nn.log_softmax(logits, axis=1)


# ----------------------------- Main -------------------------------------------

if __name__ == "__main__":
    NUM_FEATURES, NUM_CLASSES = 4, 4
    NUM_GRAPHS, NODES_PER_GRAPH, EDGES_PER_GRAPH = 2, 8, 24
    TE = 32  # edge-tile size (reduction grid axis)

    key = jax.random.PRNGKey(0)
    kp, kx, ke, ksrc, kdst = jax.random.split(key, 5)
    params = init_params(kp, NUM_FEATURES, NUM_CLASSES)

    N = NUM_GRAPHS * NODES_PER_GRAPH           # 16 nodes total
    E = NUM_GRAPHS * EDGES_PER_GRAPH           # 48 edges total
    x = jax.random.normal(kx, (N, NUM_FEATURES), jnp.float32)
    # Random intra-graph edges (src -> dst), PyG convention edge_index[0]=src, [1]=dst.
    offs = (jnp.arange(NUM_GRAPHS, dtype=jnp.int32) * NODES_PER_GRAPH)[:, None]
    src = (jax.random.randint(ksrc, (NUM_GRAPHS, EDGES_PER_GRAPH), 0, NODES_PER_GRAPH)
           + offs).reshape(-1).astype(jnp.int32)
    dst = (jax.random.randint(kdst, (NUM_GRAPHS, EDGES_PER_GRAPH), 0, NODES_PER_GRAPH)
           + offs).reshape(-1).astype(jnp.int32)
    edge_attr = jax.random.uniform(ke, (E, 1), jnp.float32)
    batch = jnp.repeat(jnp.arange(NUM_GRAPHS, dtype=jnp.int32), NODES_PER_GRAPH)

    x_p, ea_p, gmat, smat_t, pool = build_structure(
        x, edge_attr, src, dst, batch, NUM_GRAPHS, te=TE)

    out = gnn_forward(params, x_p, ea_p, gmat, smat_t, pool, te=TE)
    out = jax.block_until_ready(out)

    assert out.shape == (NUM_GRAPHS, NUM_CLASSES)
    assert bool(jnp.all(jnp.isfinite(out)))
    # log_softmax rows must exponentiate-sum to 1
    assert bool(jnp.allclose(jnp.sum(jnp.exp(out), axis=1), 1.0, atol=1e-4))
    # match the pure-JAX reference of the original module
    ref = reference_forward(params, x, edge_attr, src, dst, batch, NUM_GRAPHS)
    assert bool(jnp.allclose(out, ref, atol=1e-4, rtol=1e-4))
    print("KERNEL_OK")
</pallas_src>

<mosaic_0001>
module attributes {stable_mosaic.version = 11 : i64} {
  func.func @_fused_gnn_kernel(%arg0: i32, %arg1: i32, %arg2: memref<16x4xf32, #tpu.memory_space<vmem>>, %arg3: memref<32x1xf32, #tpu.memory_space<vmem>>, %arg4: memref<32x16xf32, #tpu.memory_space<vmem>>, %arg5: memref<32x16xf32, #tpu.memory_space<vmem>>, %arg6: memref<2x16xf32, #tpu.memory_space<vmem>>, %arg7: memref<1x10xf32, #tpu.memory_space<vmem>>, %arg8: memref<1x10xf32, #tpu.memory_space<vmem>>, %arg9: memref<10x64xf32, #tpu.memory_space<vmem>>, %arg10: memref<1x64xf32, #tpu.memory_space<vmem>>, %arg11: memref<4x16xf32, #tpu.memory_space<vmem>>, %arg12: memref<1x16xf32, #tpu.memory_space<vmem>>, %arg13: memref<1x10xf32, #tpu.memory_space<vmem>>, %arg14: memref<1x10xf32, #tpu.memory_space<vmem>>, %arg15: memref<10x512xf32, #tpu.memory_space<vmem>>, %arg16: memref<1x512xf32, #tpu.memory_space<vmem>>, %arg17: memref<16x32xf32, #tpu.memory_space<vmem>>, %arg18: memref<1x32xf32, #tpu.memory_space<vmem>>, %arg19: memref<32x64xf32, #tpu.memory_space<vmem>>, %arg20: memref<1x64xf32, #tpu.memory_space<vmem>>, %arg21: memref<64x4xf32, #tpu.memory_space<vmem>>, %arg22: memref<1x4xf32, #tpu.memory_space<vmem>>, %arg23: memref<2x4xf32, #tpu.memory_space<vmem>>, %arg24: memref<16x16xf32, #tpu.memory_space<vmem>>, %arg25: memref<16x32xf32, #tpu.memory_space<vmem>>, %arg26: memref<16x16xf32, #tpu.memory_space<vmem>>) attributes {dimension_semantics = [#tpu.dimension_semantics<arbitrary>, #tpu.dimension_semantics<arbitrary>], iteration_bounds = array<i64: 2, 2>, scalar_prefetch = 0 : i64, scratch_operands = 3 : i64, tpu.core_type = #tpu.core_type<tc>, window_params = [{pipeline_mode = #tpu.pipeline_mode<synchronous>, transform_indices = @transform_0, window_bounds = array<i64: 16, 4>}, {transform_indices = @transform_1, window_bounds = array<i64: 32, 1>}, {transform_indices = @transform_2, window_bounds = array<i64: 32, 16>}, {transform_indices = @transform_3, window_bounds = array<i64: 32, 16>}, {pipeline_mode = #tpu.pipeline_mode<synchronous>, transform_indices = @transform_4, window_bounds = array<i64: 2, 16>}, {pipeline_mode = #tpu.pipeline_mode<synchronous>, transform_indices = @transform_5, window_bounds = array<i64: 1, 10>}, {pipeline_mode = #tpu.pipeline_mode<synchronous>, transform_indices = @transform_6, window_bounds = array<i64: 1, 10>}, {pipeline_mode = #tpu.pipeline_mode<synchronous>, transform_indices = @transform_7, window_bounds = array<i64: 10, 64>}, {pipeline_mode = #tpu.pipeline_mode<synchronous>, transform_indices = @transform_8, window_bounds = array<i64: 1, 64>}, {pipeline_mode = #tpu.pipeline_mode<synchronous>, transform_indices = @transform_9, window_bounds = array<i64: 4, 16>}, {pipeline_mode = #tpu.pipeline_mode<synchronous>, transform_indices = @transform_10, window_bounds = array<i64: 1, 16>}, {pipeline_mode = #tpu.pipeline_mode<synchronous>, transform_indices = @transform_11, window_bounds = array<i64: 1, 10>}, {pipeline_mode = #tpu.pipeline_mode<synchronous>, transform_indices = @transform_12, window_bounds = array<i64: 1, 10>}, {pipeline_mode = #tpu.pipeline_mode<synchronous>, transform_indices = @transform_13, window_bounds = array<i64: 10, 512>}, {pipeline_mode = #tpu.pipeline_mode<synchronous>, transform_indices = @transform_14, window_bounds = array<i64: 1, 512>}, {pipeline_mode = #tpu.pipeline_mode<synchronous>, transform_indices = @transform_15, window_bounds = array<i64: 16, 32>}, {pipeline_mode = #tpu.pipeline_mode<synchronous>, transform_indices = @transform_16, window_bounds = array<i64: 1, 32>}, {pipeline_mode = #tpu.pipeline_mode<synchronous>, transform_indices = @transform_17, window_bounds = array<i64: 32, 64>}, {pipeline_mode = #tpu.pipeline_mode<synchronous>, transform_indices = @transform_18, window_bounds = array<i64: 1, 64>}, {pipeline_mode = #tpu.pipeline_mode<synchronous>, transform_indices = @transform_19, window_bounds = array<i64: 64, 4>}, {pipeline_mode = #tpu.pipeline_mode<synchronous>, transform_indices = @transform_20, window_bounds = array<i64: 1, 4>}, {pipeline_mode = #tpu.pipeline_mode<synchronous>, transform_indices = @transform_21, window_bounds = array<i64: 2, 4>}]} {
    %c0_i32 = arith.constant 0 : i32
    %0 = arith.cmpi eq, %arg0, %c0_i32 : i32
    %1 = arith.extui %0 : i1 to i32
    %c0_i32_0 = arith.constant 0 : i32
    %2 = arith.cmpi ne, %1, %c0_i32_0 : i32
    scf.if %2 {
      %c0_i32_2 = arith.constant 0 : i32
      %6 = arith.cmpi eq, %arg1, %c0_i32_2 : i32
      %7 = arith.extui %6 : i1 to i32
      %c0_i32_3 = arith.constant 0 : i32
      %8 = arith.cmpi ne, %7, %c0_i32_3 : i32
      scf.if %8 {
        %cst_28 = arith.constant 0.000000e+00 : f32
        %54 = vector.broadcast %cst_28 : f32 to vector<16x16xf32>
        %c0_29 = arith.constant 0 : index
        %c0_30 = arith.constant 0 : index
        %55 = vector.load %arg24[%c0_29, %c0_30] : memref<16x16xf32, #tpu.memory_space<vmem>>, vector<16x16xf32>
        tpu.vector_store %arg24[%c0_29, %c0_30], %54 {strides = array<i32>} : memref<16x16xf32, #tpu.memory_space<vmem>>, vector<16x16xf32>,
      } else {
      }
      %c0 = arith.constant 0 : index
      %c0_4 = arith.constant 0 : index
      %9 = vector.load %arg4[%c0, %c0_4] : memref<32x16xf32, #tpu.memory_space<vmem>>, vector<32x16xf32>
      %c0_5 = arith.constant 0 : index
      %c0_6 = arith.constant 0 : index
      %10 = vector.load %arg2[%c0_5, %c0_6] : memref<16x4xf32, #tpu.memory_space<vmem>>, vector<16x4xf32>
      %cst = arith.constant dense<0.000000e+00> : vector<32x4xf32>
      %11 = tpu.matmul %9, %10, %cst {dimension_numbers = #tpu.dot_dimension_numbers<[1], [0], [0], [1], [0, 0, 1, 1], [], []>} : vector<32x16xf32>, vector<16x4xf32>, vector<32x4xf32> -> vector<32x4xf32>
      %c0_7 = arith.constant 0 : index
      %c0_8 = arith.constant 0 : index
      %12 = vector.load %arg24[%c0_7, %c0_8] : memref<16x16xf32, #tpu.memory_space<vmem>>, vector<16x16xf32>
      %c0_9 = arith.constant 0 : index
      %c0_10 = arith.constant 0 : index
      %13 = vector.load %arg3[%c0_9, %c0_10] : memref<32x1xf32, #tpu.memory_space<vmem>>, vector<32x1xf32>
      %c0_11 = arith.constant 0 : index
      %c0_12 = arith.constant 0 : index
      %14 = vector.load %arg7[%c0_11, %c0_12] : memref<1x10xf32, #tpu.memory_space<vmem>>, vector<1x10xf32>
      %15 = vector.broadcast %13 : vector<32x1xf32> to vector<32x10xf32>
      %16 = vector.broadcast %14 : vector<1x10xf32> to vector<32x10xf32>
      %17 = arith.mulf %15, %16 : vector<32x10xf32>
      %c0_13 = arith.constant 0 : index
      %c0_14 = arith.constant 0 : index
      %18 = vector.load %arg8[%c0_13, %c0_14] : memref<1x10xf32, #tpu.memory_space<vmem>>, vector<1x10xf32>
      %19 = vector.broadcast %18 : vector<1x10xf32> to vector<32x10xf32>
      %20 = arith.addf %17, %19 : vector<32x10xf32>
      %cst_15 = arith.constant 0.000000e+00 : f32
      %21 = vector.broadcast %cst_15 : f32 to vector<32x10xf32>
      %22 = arith.maximumf %20, %21 : vector<32x10xf32>
      %c0_16 = arith.constant 0 : index
      %c0_17 = arith.constant 0 : index
      %23 = vector.load %arg9[%c0_16, %c0_17] : memref<10x64xf32, #tpu.memory_space<vmem>>, vector<10x64xf32>
      %cst_18 = arith.constant dense<0.000000e+00> : vector<32x64xf32>
      %24 = tpu.matmul %22, %23, %cst_18 {dimension_numbers = #tpu.dot_dimension_numbers<[1], [0], [0], [1], [0, 0, 1, 1], [], []>} : vector<32x10xf32>, vector<10x64xf32>, vector<32x64xf32> -> vector<32x64xf32>
      %c0_19 = arith.constant 0 : index
      %c0_20 = arith.constant 0 : index
      %25 = vector.load %arg10[%c0_19, %c0_20] : memref<1x64xf32, #tpu.memory_space<vmem>>, vector<1x64xf32>
      %26 = vector.broadcast %25 : vector<1x64xf32> to vector<32x64xf32>
      %27 = arith.addf %24, %26 : vector<32x64xf32>
      %28 = vector.extract_strided_slice %11 {offsets = [0, 0], sizes = [32, 1], strides = [1, 1]} : vector<32x4xf32> to vector<32x1xf32>
      %29 = vector.extract_strided_slice %27 {offsets = [0, 0], sizes = [32, 16], strides = [1, 1]} : vector<32x64xf32> to vector<32x16xf32>
      %30 = vector.broadcast %28 : vector<32x1xf32> to vector<32x16xf32>
      %31 = arith.mulf %30, %29 : vector<32x16xf32>
      %32 = vector.extract_strided_slice %11 {offsets = [0, 1], sizes = [32, 1], strides = [1, 1]} : vector<32x4xf32> to vector<32x1xf32>
      %33 = vector.extract_strided_slice %27 {offsets = [0, 16], sizes = [32, 16], strides = [1, 1]} : vector<32x64xf32> to vector<32x16xf32>
      %34 = vector.broadcast %32 : vector<32x1xf32> to vector<32x16xf32>
      %35 = arith.mulf %34, %33 : vector<32x16xf32>
      %36 = arith.addf %31, %35 : vector<32x16xf32>
      %37 = vector.extract_strided_slice %11 {offsets = [0, 2], sizes = [32, 1], strides = [1, 1]} : vector<32x4xf32> to vector<32x1xf32>
      %38 = vector.extract_strided_slice %27 {offsets = [0, 32], sizes = [32, 16], strides = [1, 1]} : vector<32x64xf32> to vector<32x16xf32>
      %39 = vector.broadcast %37 : vector<32x1xf32> to vector<32x16xf32>
      %40 = arith.mulf %39, %38 : vector<32x16xf32>
      %41 = arith.addf %36, %40 : vector<32x16xf32>
      %42 = vector.extract_strided_slice %11 {offsets = [0, 3], sizes = [32, 1], strides = [1, 1]} : vector<32x4xf32> to vector<32x1xf32>
      %43 = vector.extract_strided_slice %27 {offsets = [0, 48], sizes = [32, 16], strides = [1, 1]} : vector<32x64xf32> to vector<32x16xf32>
      %44 = vector.broadcast %42 : vector<32x1xf32> to vector<32x16xf32>
      %45 = arith.mulf %44, %43 : vector<32x16xf32>
      %46 = arith.addf %41, %45 : vector<32x16xf32>
      %c0_21 = arith.constant 0 : index
      %c0_22 = arith.constant 0 : index
      %47 = vector.load %arg5[%c0_21, %c0_22] : memref<32x16xf32, #tpu.memory_space<vmem>>, vector<32x16xf32>
      %cst_23 = arith.constant dense<0.000000e+00> : vector<16x16xf32>
      %48 = tpu.matmul %47, %46, %cst_23 {dimension_numbers = #tpu.dot_dimension_numbers<[0], [0], [1], [1], [0, 1, 1, 1], [], []>} : vector<32x16xf32>, vector<32x16xf32>, vector<16x16xf32> -> vector<16x16xf32>
      %49 = arith.addf %12, %48 : vector<16x16xf32>
      %c0_24 = arith.constant 0 : index
      %c0_25 = arith.constant 0 : index
      %50 = vector.load %arg24[%c0_24, %c0_25] : memref<16x16xf32, #tpu.memory_space<vmem>>, vector<16x16xf32>
      tpu.vector_store %arg24[%c0_24, %c0_25], %49 {strides = array<i32>} : memref<16x16xf32, #tpu.memory_space<vmem>>, vector<16x16xf32>,
      %c1_i32_26 = arith.constant 1 : i32
      %51 = arith.cmpi eq, %arg1, %c1_i32_26 : i32
      %52 = arith.extui %51 : i1 to i32
      %c0_i32_27 = arith.constant 0 : i32
      %53 = arith.cmpi ne, %52, %c0_i32_27 : i32
      scf.if %53 {
        %c0_28 = arith.constant 0 : index
        %c0_29 = arith.constant 0 : index
        %54 = vector.load %arg24[%c0_28, %c0_29] : memref<16x16xf32, #tpu.memory_space<vmem>>, vector<16x16xf32>
        %c0_30 = arith.constant 0 : index
        %c0_31 = arith.constant 0 : index
        %55 = vector.load %arg2[%c0_30, %c0_31] : memref<16x4xf32, #tpu.memory_space<vmem>>, vector<16x4xf32>
        %c0_32 = arith.constant 0 : index
        %c0_33 = arith.constant 0 : index
        %56 = vector.load %arg11[%c0_32, %c0_33] : memref<4x16xf32, #tpu.memory_space<vmem>>, vector<4x16xf32>
        %cst_34 = arith.constant dense<0.000000e+00> : vector<16x16xf32>
        %57 = tpu.matmul %55, %56, %cst_34 {dimension_numbers = #tpu.dot_dimension_numbers<[1], [0], [0], [1], [0, 0, 1, 1], [], []>} : vector<16x4xf32>, vector<4x16xf32>, vector<16x16xf32> -> vector<16x16xf32>
        %58 = arith.addf %54, %57 : vector<16x16xf32>
        %c0_35 = arith.constant 0 : index
        %c0_36 = arith.constant 0 : index
        %59 = vector.load %arg12[%c0_35, %c0_36] : memref<1x16xf32, #tpu.memory_space<vmem>>, vector<1x16xf32>
        %60 = vector.broadcast %59 : vector<1x16xf32> to vector<16x16xf32>
        %61 = arith.addf %58, %60 : vector<16x16xf32>
        %cst_37 = arith.constant 0.000000e+00 : f32
        %62 = vector.broadcast %cst_37 : f32 to vector<16x16xf32>
        %63 = arith.cmpf ogt, %61, %62 : vector<16x16xf32>
        %64 = math.exp %61 : vector<16x16xf32>
        %cst_38 = arith.constant 1.000000e+00 : f32
        %65 = vector.broadcast %cst_38 : f32 to vector<16x16xf32>
        %66 = arith.subf %64, %65 : vector<16x16xf32>
        %67 = arith.select %63, %61, %66 : vector<16x16xi1>, vector<16x16xf32>
        %c0_39 = arith.constant 0 : index
        %c0_40 = arith.constant 0 : index
        %68 = vector.load %arg26[%c0_39, %c0_40] : memref<16x16xf32, #tpu.memory_space<vmem>>, vector<16x16xf32>
        tpu.vector_store %arg26[%c0_39, %c0_40], %67 {strides = array<i32>} : memref<16x16xf32, #tpu.memory_space<vmem>>, vector<16x16xf32>,
      } else {
      }
    } else {
    }
    %c1_i32 = arith.constant 1 : i32
    %3 = arith.cmpi eq, %arg0, %c1_i32 : i32
    %4 = arith.extui %3 : i1 to i32
    %c0_i32_1 = arith.constant 0 : i32
    %5 = arith.cmpi ne, %4, %c0_i32_1 : i32
    scf.if %5 {
      %c0_i32_2 = arith.constant 0 : i32
      %6 = arith.cmpi eq, %arg1, %c0_i32_2 : i32
      %7 = arith.extui %6 : i1 to i32
      %c0_i32_3 = arith.constant 0 : i32
      %8 = arith.cmpi ne, %7, %c0_i32_3 : i32
      scf.if %8 {
        %cst_28 = arith.constant 0.000000e+00 : f32
        %114 = vector.broadcast %cst_28 : f32 to vector<16x32xf32>
        %c0_29 = arith.constant 0 : index
        %c0_30 = arith.constant 0 : index
        %115 = vector.load %arg25[%c0_29, %c0_30] : memref<16x32xf32, #tpu.memory_space<vmem>>, vector<16x32xf32>
        tpu.vector_store %arg25[%c0_29, %c0_30], %114 {strides = array<i32>} : memref<16x32xf32, #tpu.memory_space<vmem>>, vector<16x32xf32>,
      } else {
      }
      %c0 = arith.constant 0 : index
      %c0_4 = arith.constant 0 : index
      %9 = vector.load %arg4[%c0, %c0_4] : memref<32x16xf32, #tpu.memory_space<vmem>>, vector<32x16xf32>
      %c0_5 = arith.constant 0 : index
      %c0_6 = arith.constant 0 : index
      %10 = vector.load %arg26[%c0_5, %c0_6] : memref<16x16xf32, #tpu.memory_space<vmem>>, vector<16x16xf32>
      %cst = arith.constant dense<0.000000e+00> : vector<32x16xf32>
      %11 = tpu.matmul %9, %10, %cst {dimension_numbers = #tpu.dot_dimension_numbers<[1], [0], [0], [1], [0, 0, 1, 1], [], []>} : vector<32x16xf32>, vector<16x16xf32>, vector<32x16xf32> -> vector<32x16xf32>
      %c0_7 = arith.constant 0 : index
      %c0_8 = arith.constant 0 : index
      %12 = vector.load %arg25[%c0_7, %c0_8] : memref<16x32xf32, #tpu.memory_space<vmem>>, vector<16x32xf32>
      %c0_9 = arith.constant 0 : index
      %c0_10 = arith.constant 0 : index
      %13 = vector.load %arg3[%c0_9, %c0_10] : memref<32x1xf32, #tpu.memory_space<vmem>>, vector<32x1xf32>
      %c0_11 = arith.constant 0 : index
      %c0_12 = arith.constant 0 : index
      %14 = vector.load %arg13[%c0_11, %c0_12] : memref<1x10xf32, #tpu.memory_space<vmem>>, vector<1x10xf32>
      %15 = vector.broadcast %13 : vector<32x1xf32> to vector<32x10xf32>
      %16 = vector.broadcast %14 : vector<1x10xf32> to vector<32x10xf32>
      %17 = arith.mulf %15, %16 : vector<32x10xf32>
      %c0_13 = arith.constant 0 : index
      %c0_14 = arith.constant 0 : index
      %18 = vector.load %arg14[%c0_13, %c0_14] : memref<1x10xf32, #tpu.memory_space<vmem>>, vector<1x10xf32>
      %19 = vector.broadcast %18 : vector<1x10xf32> to vector<32x10xf32>
      %20 = arith.addf %17, %19 : vector<32x10xf32>
      %cst_15 = arith.constant 0.000000e+00 : f32
      %21 = vector.broadcast %cst_15 : f32 to vector<32x10xf32>
      %22 = arith.maximumf %20, %21 : vector<32x10xf32>
      %c0_16 = arith.constant 0 : index
      %c0_17 = arith.constant 0 : index
      %23 = vector.load %arg15[%c0_16, %c0_17] : memref<10x512xf32, #tpu.memory_space<vmem>>, vector<10x512xf32>
      %cst_18 = arith.constant dense<0.000000e+00> : vector<32x512xf32>
      %24 = tpu.matmul %22, %23, %cst_18 {dimension_numbers = #tpu.dot_dimension_numbers<[1], [0], [0], [1], [0, 0, 1, 1], [], []>} : vector<32x10xf32>, vector<10x512xf32>, vector<32x512xf32> -> vector<32x512xf32>
      %c0_19 = arith.constant 0 : index
      %c0_20 = arith.constant 0 : index
      %25 = vector.load %arg16[%c0_19, %c0_20] : memref<1x512xf32, #tpu.memory_space<vmem>>, vector<1x512xf32>
      %26 = vector.broadcast %25 : vector<1x512xf32> to vector<32x512xf32>
      %27 = arith.addf %24, %26 : vector<32x512xf32>
      %28 = vector.extract_strided_slice %11 {offsets = [0, 0], sizes = [32, 1], strides = [1, 1]} : vector<32x16xf32> to vector<32x1xf32>
      %29 = vector.extract_strided_slice %27 {offsets = [0, 0], sizes = [32, 32], strides = [1, 1]} : vector<32x512xf32> to vector<32x32xf32>
      %30 = vector.broadcast %28 : vector<32x1xf32> to vector<32x32xf32>
      %31 = arith.mulf %30, %29 : vector<32x32xf32>
      %32 = vector.extract_strided_slice %11 {offsets = [0, 1], sizes = [32, 1], strides = [1, 1]} : vector<32x16xf32> to vector<32x1xf32>
      %33 = vector.extract_strided_slice %27 {offsets = [0, 32], sizes = [32, 32], strides = [1, 1]} : vector<32x512xf32> to vector<32x32xf32>
      %34 = vector.broadcast %32 : vector<32x1xf32> to vector<32x32xf32>
      %35 = arith.mulf %34, %33 : vector<32x32xf32>
      %36 = arith.addf %31, %35 : vector<32x32xf32>
      %37 = vector.extract_strided_slice %11 {offsets = [0, 2], sizes = [32, 1], strides = [1, 1]} : vector<32x16xf32> to vector<32x1xf32>
      %38 = vector.extract_strided_slice %27 {offsets = [0, 64], sizes = [32, 32], strides = [1, 1]} : vector<32x512xf32> to vector<32x32xf32>
      %39 = vector.broadcast %37 : vector<32x1xf32> to vector<32x32xf32>
      %40 = arith.mulf %39, %38 : vector<32x32xf32>
      %41 = arith.addf %36, %40 : vector<32x32xf32>
      %42 = vector.extract_strided_slice %11 {offsets = [0, 3], sizes = [32, 1], strides = [1, 1]} : vector<32x16xf32> to vector<32x1xf32>
      %43 = vector.extract_strided_slice %27 {offsets = [0, 96], sizes = [32, 32], strides = [1, 1]} : vector<32x512xf32> to vector<32x32xf32>
      %44 = vector.broadcast %42 : vector<32x1xf32> to vector<32x32xf32>
      %45 = arith.mulf %44, %43 : vector<32x32xf32>
      %46 = arith.addf %41, %45 : vector<32x32xf32>
      %47 = vector.extract_strided_slice %11 {offsets = [0, 4], sizes = [32, 1], strides = [1, 1]} : vector<32x16xf32> to vector<32x1xf32>
      %48 = vector.extract_strided_slice %27 {offsets = [0, 128], sizes = [32, 32], strides = [1, 1]} : vector<32x512xf32> to vector<32x32xf32>
      %49 = vector.broadcast %47 : vector<32x1xf32> to vector<32x32xf32>
      %50 = arith.mulf %49, %48 : vector<32x32xf32>
      %51 = arith.addf %46, %50 : vector<32x32xf32>
      %52 = vector.extract_strided_slice %11 {offsets = [0, 5], sizes = [32, 1], strides = [1, 1]} : vector<32x16xf32> to vector<32x1xf32>
      %53 = vector.extract_strided_slice %27 {offsets = [0, 160], sizes = [32, 32], strides = [1, 1]} : vector<32x512xf32> to vector<32x32xf32>
      %54 = vector.broadcast %52 : vector<32x1xf32> to vector<32x32xf32>
      %55 = arith.mulf %54, %53 : vector<32x32xf32>
      %56 = arith.addf %51, %55 : vector<32x32xf32>
      %57 = vector.extract_strided_slice %11 {offsets = [0, 6], sizes = [32, 1], strides = [1, 1]} : vector<32x16xf32> to vector<32x1xf32>
      %58 = vector.extract_strided_slice %27 {offsets = [0, 192], sizes = [32, 32], strides = [1, 1]} : vector<32x512xf32> to vector<32x32xf32>
      %59 = vector.broadcast %57 : vector<32x1xf32> to vector<32x32xf32>
      %60 = arith.mulf %59, %58 : vector<32x32xf32>
      %61 = arith.addf %56, %60 : vector<32x32xf32>
      %62 = vector.extract_strided_slice %11 {offsets = [0, 7], sizes = [32, 1], strides = [1, 1]} : vector<32x16xf32> to vector<32x1xf32>
      %63 = vector.extract_strided_slice %27 {offsets = [0, 224], sizes = [32, 32], strides = [1, 1]} : vector<32x512xf32> to vector<32x32xf32>
      %64 = vector.broadcast %62 : vector<32x1xf32> to vector<32x32xf32>
      %65 = arith.mulf %64, %63 : vector<32x32xf32>
      %66 = arith.addf %61, %65 : vector<32x32xf32>
      %67 = vector.extract_strided_slice %11 {offsets = [0, 8], sizes = [32, 1], strides = [1, 1]} : vector<32x16xf32> to vector<32x1xf32>
      %68 = vector.extract_strided_slice %27 {offsets = [0, 256], sizes = [32, 32], strides = [1, 1]} : vector<32x512xf32> to vector<32x32xf32>
      %69 = vector.broadcast %67 : vector<32x1xf32> to vector<32x32xf32>
      %70 = arith.mulf %69, %68 : vector<32x32xf32>
      %71 = arith.addf %66, %70 : vector<32x32xf32>
      %72 = vector.extract_strided_slice %11 {offsets = [0, 9], sizes = [32, 1], strides = [1, 1]} : vector<32x16xf32> to vector<32x1xf32>
      %73 = vector.extract_strided_slice %27 {offsets = [0, 288], sizes = [32, 32], strides = [1, 1]} : vector<32x512xf32> to vector<32x32xf32>
      %74 = vector.broadcast %72 : vector<32x1xf32> to vector<32x32xf32>
      %75 = arith.mulf %74, %73 : vector<32x32xf32>
      %76 = arith.addf %71, %75 : vector<32x32xf32>
      %77 = vector.extract_strided_slice %11 {offsets = [0, 10], sizes = [32, 1], strides = [1, 1]} : vector<32x16xf32> to vector<32x1xf32>
      %78 = vector.extract_strided_slice %27 {offsets = [0, 320], sizes = [32, 32], strides = [1, 1]} : vector<32x512xf32> to vector<32x32xf32>
      %79 = vector.broadcast %77 : vector<32x1xf32> to vector<32x32xf32>
      %80 = arith.mulf %79, %78 : vector<32x32xf32>
      %81 = arith.addf %76, %80 : vector<32x32xf32>
      %82 = vector.extract_strided_slice %11 {offsets = [0, 11], sizes = [32, 1], strides = [1, 1]} : vector<32x16xf32> to vector<32x1xf32>
      %83 = vector.extract_strided_slice %27 {offsets = [0, 352], sizes = [32, 32], strides = [1, 1]} : vector<32x512xf32> to vector<32x32xf32>
      %84 = vector.broadcast %82 : vector<32x1xf32> to vector<32x32xf32>
      %85 = arith.mulf %84, %83 : vector<32x32xf32>
      %86 = arith.addf %81, %85 : vector<32x32xf32>
      %87 = vector.extract_strided_slice %11 {offsets = [0, 12], sizes = [32, 1], strides = [1, 1]} : vector<32x16xf32> to vector<32x1xf32>
      %88 = vector.extract_strided_slice %27 {offsets = [0, 384], sizes = [32, 32], strides = [1, 1]} : vector<32x512xf32> to vector<32x32xf32>
      %89 = vector.broadcast %87 : vector<32x1xf32> to vector<32x32xf32>
      %90 = arith.mulf %89, %88 : vector<32x32xf32>
      %91 = arith.addf %86, %90 : vector<32x32xf32>
      %92 = vector.extract_strided_slice %11 {offsets = [0, 13], sizes = [32, 1], strides = [1, 1]} : vector<32x16xf32> to vector<32x1xf32>
      %93 = vector.extract_strided_slice %27 {offsets = [0, 416], sizes = [32, 32], strides = [1, 1]} : vector<32x512xf32> to vector<32x32xf32>
      %94 = vector.broadcast %92 : vector<32x1xf32> to vector<32x32xf32>
      %95 = arith.mulf %94, %93 : vector<32x32xf32>
      %96 = arith.addf %91, %95 : vector<32x32xf32>
      %97 = vector.extract_strided_slice %11 {offsets = [0, 14], sizes = [32, 1], strides = [1, 1]} : vector<32x16xf32> to vector<32x1xf32>
      %98 = vector.extract_strided_slice %27 {offsets = [0, 448], sizes = [32, 32], strides = [1, 1]} : vector<32x512xf32> to vector<32x32xf32>
      %99 = vector.broadcast %97 : vector<32x1xf32> to vector<32x32xf32>
      %100 = arith.mulf %99, %98 : vector<32x32xf32>
      %101 = arith.addf %96, %100 : vector<32x32xf32>
      %102 = vector.extract_strided_slice %11 {offsets = [0, 15], sizes = [32, 1], strides = [1, 1]} : vector<32x16xf32> to vector<32x1xf32>
      %103 = vector.extract_strided_slice %27 {offsets = [0, 480], sizes = [32, 32], strides = [1, 1]} : vector<32x512xf32> to vector<32x32xf32>
      %104 = vector.broadcast %102 : vector<32x1xf32> to vector<32x32xf32>
      %105 = arith.mulf %104, %103 : vector<32x32xf32>
      %106 = arith.addf %101, %105 : vector<32x32xf32>
      %c0_21 = arith.constant 0 : index
      %c0_22 = arith.constant 0 : index
      %107 = vector.load %arg5[%c0_21, %c0_22] : memref<32x16xf32, #tpu.memory_space<vmem>>, vector<32x16xf32>
      %cst_23 = arith.constant dense<0.000000e+00> : vector<16x32xf32>
      %108 = tpu.matmul %107, %106, %cst_23 {dimension_numbers = #tpu.dot_dimension_numbers<[0], [0], [1], [1], [0, 1, 1, 1], [], []>} : vector<32x16xf32>, vector<32x32xf32>, vector<16x32xf32> -> vector<16x32xf32>
      %109 = arith.addf %12, %108 : vector<16x32xf32>
      %c0_24 = arith.constant 0 : index
      %c0_25 = arith.constant 0 : index
      %110 = vector.load %arg25[%c0_24, %c0_25] : memref<16x32xf32, #tpu.memory_space<vmem>>, vector<16x32xf32>
      tpu.vector_store %arg25[%c0_24, %c0_25], %109 {strides = array<i32>} : memref<16x32xf32, #tpu.memory_space<vmem>>, vector<16x32xf32>,
      %c1_i32_26 = arith.constant 1 : i32
      %111 = arith.cmpi eq, %arg1, %c1_i32_26 : i32
      %112 = arith.extui %111 : i1 to i32
      %c0_i32_27 = arith.constant 0 : i32
      %113 = arith.cmpi ne, %112, %c0_i32_27 : i32
      scf.if %113 {
        %c0_28 = arith.constant 0 : index
        %c0_29 = arith.constant 0 : index
        %114 = vector.load %arg25[%c0_28, %c0_29] : memref<16x32xf32, #tpu.memory_space<vmem>>, vector<16x32xf32>
        %c0_30 = arith.constant 0 : index
        %c0_31 = arith.constant 0 : index
        %115 = vector.load %arg26[%c0_30, %c0_31] : memref<16x16xf32, #tpu.memory_space<vmem>>, vector<16x16xf32>
        %c0_32 = arith.constant 0 : index
        %c0_33 = arith.constant 0 : index
        %116 = vector.load %arg17[%c0_32, %c0_33] : memref<16x32xf32, #tpu.memory_space<vmem>>, vector<16x32xf32>
        %cst_34 = arith.constant dense<0.000000e+00> : vector<16x32xf32>
        %117 = tpu.matmul %115, %116, %cst_34 {dimension_numbers = #tpu.dot_dimension_numbers<[1], [0], [0], [1], [0, 0, 1, 1], [], []>} : vector<16x16xf32>, vector<16x32xf32>, vector<16x32xf32> -> vector<16x32xf32>
        %118 = arith.addf %114, %117 : vector<16x32xf32>
        %c0_35 = arith.constant 0 : index
        %c0_36 = arith.constant 0 : index
        %119 = vector.load %arg18[%c0_35, %c0_36] : memref<1x32xf32, #tpu.memory_space<vmem>>, vector<1x32xf32>
        %120 = vector.broadcast %119 : vector<1x32xf32> to vector<16x32xf32>
        %121 = arith.addf %118, %120 : vector<16x32xf32>
        %cst_37 = arith.constant 0.000000e+00 : f32
        %122 = vector.broadcast %cst_37 : f32 to vector<16x32xf32>
        %123 = arith.cmpf ogt, %121, %122 : vector<16x32xf32>
        %124 = math.exp %121 : vector<16x32xf32>
        %cst_38 = arith.constant 1.000000e+00 : f32
        %125 = vector.broadcast %cst_38 : f32 to vector<16x32xf32>
        %126 = arith.subf %124, %125 : vector<16x32xf32>
        %127 = arith.select %123, %121, %126 : vector<16x32xi1>, vector<16x32xf32>
        %c0_39 = arith.constant 0 : index
        %c0_40 = arith.constant 0 : index
        %128 = vector.load %arg6[%c0_39, %c0_40] : memref<2x16xf32, #tpu.memory_space<vmem>>, vector<2x16xf32>
        %cst_41 = arith.constant dense<0.000000e+00> : vector<2x32xf32>
        %129 = tpu.matmul %128, %127, %cst_41 {dimension_numbers = #tpu.dot_dimension_numbers<[1], [0], [0], [1], [0, 0, 1, 1], [], []>} : vector<2x16xf32>, vector<16x32xf32>, vector<2x32xf32> -> vector<2x32xf32>
        %c0_42 = arith.constant 0 : index
        %c0_43 = arith.constant 0 : index
        %130 = vector.load %arg19[%c0_42, %c0_43] : memref<32x64xf32, #tpu.memory_space<vmem>>, vector<32x64xf32>
        %cst_44 = arith.constant dense<0.000000e+00> : vector<2x64xf32>
        %131 = tpu.matmul %129, %130, %cst_44 {dimension_numbers = #tpu.dot_dimension_numbers<[1], [0], [0], [1], [0, 0, 1, 1], [], []>} : vector<2x32xf32>, vector<32x64xf32>, vector<2x64xf32> -> vector<2x64xf32>
        %c0_45 = arith.constant 0 : index
        %c0_46 = arith.constant 0 : index
        %132 = vector.load %arg20[%c0_45, %c0_46] : memref<1x64xf32, #tpu.memory_space<vmem>>, vector<1x64xf32>
        %133 = vector.broadcast %132 : vector<1x64xf32> to vector<2x64xf32>
        %134 = arith.addf %131, %133 : vector<2x64xf32>
        %cst_47 = arith.constant 0.000000e+00 : f32
        %135 = vector.broadcast %cst_47 : f32 to vector<2x64xf32>
        %136 = arith.cmpf ogt, %134, %135 : vector<2x64xf32>
        %137 = math.exp %134 : vector<2x64xf32>
        %cst_48 = arith.constant 1.000000e+00 : f32
        %138 = vector.broadcast %cst_48 : f32 to vector<2x64xf32>
        %139 = arith.subf %137, %138 : vector<2x64xf32>
        %140 = arith.select %136, %134, %139 : vector<2x64xi1>, vector<2x64xf32>
        %c0_49 = arith.constant 0 : index
        %c0_50 = arith.constant 0 : index
        %141 = vector.load %arg21[%c0_49, %c0_50] : memref<64x4xf32, #tpu.memory_space<vmem>>, vector<64x4xf32>
        %cst_51 = arith.constant dense<0.000000e+00> : vector<2x4xf32>
        %142 = tpu.matmul %140, %141, %cst_51 {dimension_numbers = #tpu.dot_dimension_numbers<[1], [0], [0], [1], [0, 0, 1, 1], [], []>} : vector<2x64xf32>, vector<64x4xf32>, vector<2x4xf32> -> vector<2x4xf32>
        %c0_52 = arith.constant 0 : index
        %c0_53 = arith.constant 0 : index
        %143 = vector.load %arg22[%c0_52, %c0_53] : memref<1x4xf32, #tpu.memory_space<vmem>>, vector<1x4xf32>
        %144 = vector.broadcast %143 : vector<1x4xf32> to vector<2x4xf32>
        %145 = arith.addf %142, %144 : vector<2x4xf32>
        %cst_54 = arith.constant dense<0xFF800000> : vector<2xf32>
        %146 = vector.multi_reduction <maximumf>, %145, %cst_54 [1] : vector<2x4xf32> to vector<2xf32>
        %147 = vector.shape_cast %146 : vector<2xf32> to vector<2x1xf32>
        %148 = vector.broadcast %147 : vector<2x1xf32> to vector<2x4xf32>
        %149 = arith.subf %145, %148 : vector<2x4xf32>
        %150 = math.exp %149 : vector<2x4xf32>
        %cst_55 = arith.constant dense<0.000000e+00> : vector<2xf32>
        %151 = vector.multi_reduction <add>, %150, %cst_55 [1] : vector<2x4xf32> to vector<2xf32>
        %152 = vector.shape_cast %151 : vector<2xf32> to vector<2x1xf32>
        %153 = math.log %152 : vector<2x1xf32>
        %154 = vector.broadcast %153 : vector<2x1xf32> to vector<2x4xf32>
        %155 = arith.subf %149, %154 : vector<2x4xf32>
        %c0_56 = arith.constant 0 : index
        %c0_57 = arith.constant 0 : index
        %156 = vector.load %arg23[%c0_56, %c0_57] : memref<2x4xf32, #tpu.memory_space<vmem>>, vector<2x4xf32>
        tpu.vector_store %arg23[%c0_56, %c0_57], %155 {strides = array<i32>} : memref<2x4xf32, #tpu.memory_space<vmem>>, vector<2x4xf32>,
      } else {
      }
    } else {
    }
    return
  }
  func.func @transform_0(%arg0: i32, %arg1: i32) -> (i32, i32) {
    %c0_i32 = arith.constant 0 : i32
    %c0_i32_0 = arith.constant 0 : i32
    %c0_i32_1 = arith.constant 0 : i32
    return %c0_i32, %c0_i32_0 : i32, i32
  }
  func.func @transform_1(%arg0: i32, %arg1: i32) -> (i32, i32) {
    %c0_i32 = arith.constant 0 : i32
    %c0_i32_0 = arith.constant 0 : i32
    return %arg1, %c0_i32 : i32, i32
  }
  func.func @transform_2(%arg0: i32, %arg1: i32) -> (i32, i32) {
    %c0_i32 = arith.constant 0 : i32
    %c0_i32_0 = arith.constant 0 : i32
    return %arg1, %c0_i32 : i32, i32
  }
  func.func @transform_3(%arg0: i32, %arg1: i32) -> (i32, i32) {
    %c0_i32 = arith.constant 0 : i32
    %c0_i32_0 = arith.constant 0 : i32
    return %arg1, %c0_i32 : i32, i32
  }
  func.func @transform_4(%arg0: i32, %arg1: i32) -> (i32, i32) {
    %c0_i32 = arith.constant 0 : i32
    %c0_i32_0 = arith.constant 0 : i32
    %c0_i32_1 = arith.constant 0 : i32
    return %c0_i32, %c0_i32_0 : i32, i32
  }
  func.func @transform_5(%arg0: i32, %arg1: i32) -> (i32, i32) {
    %c0_i32 = arith.constant 0 : i32
    %c0_i32_0 = arith.constant 0 : i32
    %c0_i32_1 = arith.constant 0 : i32
    return %c0_i32, %c0_i32_0 : i32, i32
  }
  func.func @transform_6(%arg0: i32, %arg1: i32) -> (i32, i32) {
    %c0_i32 = arith.constant 0 : i32
    %c0_i32_0 = arith.constant 0 : i32
    %c0_i32_1 = arith.constant 0 : i32
    return %c0_i32, %c0_i32_0 : i32, i32
  }
  func.func @transform_7(%arg0: i32, %arg1: i32) -> (i32, i32) {
    %c0_i32 = arith.constant 0 : i32
    %c0_i32_0 = arith.constant 0 : i32
    %c0_i32_1 = arith.constant 0 : i32
    return %c0_i32, %c0_i32_0 : i32, i32
  }
  func.func @transform_8(%arg0: i32, %arg1: i32) -> (i32, i32) {
    %c0_i32 = arith.constant 0 : i32
    %c0_i32_0 = arith.constant 0 : i32
    %c0_i32_1 = arith.constant 0 : i32
    return %c0_i32, %c0_i32_0 : i32, i32
  }
  func.func @transform_9(%arg0: i32, %arg1: i32) -> (i32, i32) {
    %c0_i32 = arith.constant 0 : i32
    %c0_i32_0 = arith.constant 0 : i32
    %c0_i32_1 = arith.constant 0 : i32
    return %c0_i32, %c0_i32_0 : i32, i32
  }
  func.func @transform_10(%arg0: i32, %arg1: i32) -> (i32, i32) {
    %c0_i32 = arith.constant 0 : i32
    %c0_i32_0 = arith.constant 0 : i32
    %c0_i32_1 = arith.constant 0 : i32
    return %c0_i32, %c0_i32_0 : i32, i32
  }
  func.func @transform_11(%arg0: i32, %arg1: i32) -> (i32, i32) {
    %c0_i32 = arith.constant 0 : i32
    %c0_i32_0 = arith.constant 0 : i32
    %c0_i32_1 = arith.constant 0 : i32
    return %c0_i32, %c0_i32_0 : i32, i32
  }
  func.func @transform_12(%arg0: i32, %arg1: i32) -> (i32, i32) {
    %c0_i32 = arith.constant 0 : i32
    %c0_i32_0 = arith.constant 0 : i32
    %c0_i32_1 = arith.constant 0 : i32
    return %c0_i32, %c0_i32_0 : i32, i32
  }
  func.func @transform_13(%arg0: i32, %arg1: i32) -> (i32, i32) {
    %c0_i32 = arith.constant 0 : i32
    %c0_i32_0 = arith.constant 0 : i32
    %c0_i32_1 = arith.constant 0 : i32
    return %c0_i32, %c0_i32_0 : i32, i32
  }
  func.func @transform_14(%arg0: i32, %arg1: i32) -> (i32, i32) {
    %c0_i32 = arith.constant 0 : i32
    %c0_i32_0 = arith.constant 0 : i32
    %c0_i32_1 = arith.constant 0 : i32
    return %c0_i32, %c0_i32_0 : i32, i32
  }
  func.func @transform_15(%arg0: i32, %arg1: i32) -> (i32, i32) {
    %c0_i32 = arith.constant 0 : i32
    %c0_i32_0 = arith.constant 0 : i32
    %c0_i32_1 = arith.constant 0 : i32
    return %c0_i32, %c0_i32_0 : i32, i32
  }
  func.func @transform_16(%arg0: i32, %arg1: i32) -> (i32, i32) {
    %c0_i32 = arith.constant 0 : i32
    %c0_i32_0 = arith.constant 0 : i32
    %c0_i32_1 = arith.constant 0 : i32
    return %c0_i32, %c0_i32_0 : i32, i32
  }
  func.func @transform_17(%arg0: i32, %arg1: i32) -> (i32, i32) {
    %c0_i32 = arith.constant 0 : i32
    %c0_i32_0 = arith.constant 0 : i32
    %c0_i32_1 = arith.constant 0 : i32
    return %c0_i32, %c0_i32_0 : i32, i32
  }
  func.func @transform_18(%arg0: i32, %arg1: i32) -> (i32, i32) {
    %c0_i32 = arith.constant 0 : i32
    %c0_i32_0 = arith.constant 0 : i32
    %c0_i32_1 = arith.constant 0 : i32
    return %c0_i32, %c0_i32_0 : i32, i32
  }
  func.func @transform_19(%arg0: i32, %arg1: i32) -> (i32, i32) {
    %c0_i32 = arith.constant 0 : i32
    %c0_i32_0 = arith.constant 0 : i32
    %c0_i32_1 = arith.constant 0 : i32
    return %c0_i32, %c0_i32_0 : i32, i32
  }
  func.func @transform_20(%arg0: i32, %arg1: i32) -> (i32, i32) {
    %c0_i32 = arith.constant 0 : i32
    %c0_i32_0 = arith.constant 0 : i32
    %c0_i32_1 = arith.constant 0 : i32
    return %c0_i32, %c0_i32_0 : i32, i32
  }
  func.func @transform_21(%arg0: i32, %arg1: i32) -> (i32, i32) {
    %c0_i32 = arith.constant 0 : i32
    %c0_i32_0 = arith.constant 0 : i32
    %c0_i32_1 = arith.constant 0 : i32
    return %c0_i32, %c0_i32_0 : i32, i32
  }
}

</mosaic_0001>

<bundles_post_ra>
// kernel: tpu_custom_call.1
= control target key start
LH: loop header
LB: loop body
LE: loop exit
PB: predicated region body
PF: predicated region fallthrough
CT: control target
= control target key end

     0   :  { %s3475_s0 = inlined_call_operand.vmem [shape: f32[16,4], index: 0, kind: input, shape index: {}]   ;;  %s3476_s1 = inlined_call_operand.vmem [shape: f32[64,1], index: 1, kind: input, shape index: {}]   ;;  %s3477_s2 = inlined_call_operand.vmem [shape: f32[64,16], index: 2, kind: input, shape index: {}]   ;;  %s3478_s3 = inlined_call_operand.vmem [shape: f32[64,16], index: 3, kind: input, shape index: {}]   ;;  %s3479_s4 = inlined_call_operand.vmem [shape: f32[2,16], index: 4, kind: input, shape index: {}]   ;;  %s3480_s5 = inlined_call_operand.vmem [shape: f32[1,10], index: 5, kind: input, shape index: {}]   ;;  %s3481_s6 = inlined_call_operand.vmem [shape: f32[1,10], index: 6, kind: input, shape index: {}]   ;;  %s3482_s7 = inlined_call_operand.vmem [shape: f32[10,64], index: 7, kind: input, shape index: {}]   ;;  %s3483_s8 = inlined_call_operand.vmem [shape: f32[1,64], index: 8, kind: input, shape index: {}]   ;;  %s3484_s9 = inlined_call_operand.vmem [shape: f32[4,16], index: 9, kind: input, shape index: {}]   ;;  %s3485_s10 = inlined_call_operand.vmem [shape: f32[1,16], index: 10, kind: input, shape index: {}]   ;;  %s3486_s11 = inlined_call_operand.vmem [shape: f32[1,10], index: 11, kind: input, shape index: {}]   ;;  %s3487_s12 = inlined_call_operand.vmem [shape: f32[1,10], index: 12, kind: input, shape index: {}]   ;;  %s3488_s13 = inlined_call_operand.vmem [shape: f32[10,512], index: 13, kind: input, shape index: {}]   ;;  %s3489_s14 = inlined_call_operand.vmem [shape: f32[1,512], index: 14, kind: input, shape index: {}]   ;;  %s3490_s15 = inlined_call_operand.vmem [shape: f32[16,32], index: 15, kind: input, shape index: {}]   ;;  %s3491_s16 = inlined_call_operand.vmem [shape: f32[1,32], index: 16, kind: input, shape index: {}]   ;;  %s3492_s17 = inlined_call_operand.vmem [shape: f32[32,64], index: 17, kind: input, shape index: {}]   ;;  %s3493_s18 = inlined_call_operand.vmem [shape: f32[1,64], index: 18, kind: input, shape index: {}]   ;;  %s3494_s19 = inlined_call_operand.vmem [shape: f32[64,4], index: 19, kind: input, shape index: {}]   ;;  %s3495_s20 = inlined_call_operand.vmem [shape: f32[1,4], index: 20, kind: input, shape index: {}]   ;;  %s3496_s21 = inlined_call_operand.hbm [shape: f32[2,4], index: 21, kind: output, shape index: {}]  }
   0x1   :  { %3502 = sst [smem:[#allocation13_spill]] %s3475_s0 }
   0x2   :  { %3503 = sst [smem:[#allocation14_spill]] %s3476_s1 }
   0x3   :  { %3504 = sst [smem:[#allocation15_spill]] %s3477_s2 }
   0x4   :  { %3505 = sst [smem:[#allocation16_spill]] %s3478_s3 }
   0x5   :  { %3506 = sst [smem:[#allocation17_spill]] %s3479_s4 }
   0x6   :  { %3507 = sst [smem:[#allocation18_spill]] %s3480_s5 }
   0x7   :  { %3508 = sst [smem:[#allocation19_spill]] %s3496_s21 }
   0x8   :  { %26 = vsyncpa [#allocation6], 0  ;;  %s2760_s2 = smov 0   ;;  %s2762_s25 = smov 0  }
   0x9   :  { %s2764_s26 = smov 0   ;;  %s2766_s27 = smov 0  }
   0xa   :  { %s2768_s3 = smov 0  }
   0xb LB: > { %3509 = sst [smem:[#allocation8_spill]] %s2611_s26  ;;  %s41_s29 = sadd.s32 1, %s2611_s26  ;;  %s2619_s3 = sphi %s2768_s3, %s32_s3   ;;  %s2615_s27 = sphi %s2766_s27, %s3528_s27   ;;  %s2611_s26 = sphi %s2764_s26, %s3527_s26   ;;  %s2607_s25 = sphi %s2762_s25, %s3526_s25   ;;  %s2603_s2 = sphi %s2760_s2, %s3525_s2  }
   0xc   : > { %3510 = sst [smem:[#allocation9_spill]] %s2615_s27  ;;  %p42_p0 = scmp.ge.s32.totalorder %s41_s29, 2 }
   0xd   : > { %3511 = sst [smem:[#allocation10_spill]] %s2619_s3  ;;  %s44_s0 = sadd.s32 1, %s2615_s27 }
   0xe   : > { %p2300_p1 = scmp.ge.s32.totalorder %s2619_s3, 1  ;;  %p618_p2 = scmp.lt.s32.totalorder %s2619_s3, 5 }
   0xf   : > { %s3530_s29 = smov (%p42_p0, %s41_s29), 0  ;;  %s3532_s0 = smov (!%p42_p0, %s44_s0), %s2615_s27 }
  0x10   : > { %3512 = sst [smem:[#allocation11_spill]] %s3530_s29  ;;  %p619_p3 = pnand %p2300_p1, %p618_p2 }
  0x11   : > { %p46_p4 = scmp.ge.s32.totalorder %s3532_s0, 2  ;;  %s2301_s4 = sshll.u32 (!%p619_p3), %s2603_s2, 2 }
  0x12   : > { %622 = sbr.rel (%p619_p3) target bundleno = 2467 (0x9a3), region = 104  ;;  %p684_p5 = scmp.lt.s32.totalorder (!%p619_p3), %s2301_s4, 7 }
  0x13   : > { %s3534_s0 = smov (%p46_p4, %s3532_s0), 0  ;;  %s3514_s23 = sld [smem:[#allocation14_spill]] (!%p619_p3) }
  0x14   : > { %3513 = sst [smem:[#allocation12_spill]] %s3534_s0  ;;  %p2307_p6 = scmp.ne.s32.totalorder (!%p619_p3), %s2607_s25, 0 }
  0x15   : > { %s3515_s26 = sld [smem:[#allocation15_spill]] (!%p619_p3) }
  0x16   : > { %s3516_s3 = sld [smem:[#allocation16_spill]] (!%p619_p3) }
  0x17   : > { %s3536_s4 = smov (!%p684_p5, %s2301_s4), 7  ;;  %p2308_p7 = scmp.ne.s32.totalorder (!%p2307_p6), %s2603_s2, 0 }
  0x18   : > { %s2302_s30 = sshll.u32 %s3536_s4, 3  ;;  %704 = sbr.rel (%p2307_p6) target bundleno = 812 (0x32c), region = 108 }
  0x19   : > { %s2799_s1 = scalar_lea.vmem %s3514_s23, %s2302_s30 }
  0x1b   : > { %s2804_s29 = scalar_lea.vmem %s3515_s26, %s2302_s30 }
  0x1c   : > { %s2809_s0 = scalar_lea.vmem %s3516_s3, %s2302_s30 }
  0x1d   : > { %708 = sbr.rel (%p2308_p7) target bundleno = 37 (0x25), region = 112 }
  0x22   : > { %vm709_vm0 = vcmask 130048   ;;  %v2621_v0 = vmov 0.0  }
  0x23   : > { %710 = vst.msk [vmem:[#allocation2] sm:$0xff] %vm709_vm0, %v2621_v0 }
  0x24   : > { %711 = vst.msk [vmem:[#allocation2 + $0x8] sm:$0xff] %vm709_vm0, %v2621_v0 }
  0x25 PF: > { %s3517_s26 = sld [smem:[#allocation13_spill]]  ;;  %v765_v2 = vld [vmem:[%s2799_s1 + $0x18] sm:$0xff]  ;;  %v763_v3 = vld [vmem:[%s2799_s1 + $0x8] sm:$0xff]  ;;  %v2622_v4 = vmov 0   ;;  %v712_v6 = vld [vmem:[%s2804_s29] sm:$0xff]  ;;  %vm718_vm1 = vcmask 130048  }
  0x26   : > { %2454 = vset.pattern.permute.xlu1 %v2622_v4  ;;  %2453 = vset.pattern.permute.xlu0 %v2622_v4  ;;  %v713_v7 = vld [vmem:[%s2804_s29 + $0x8] sm:$0xff]  ;;  %v764_v8 = vld [vmem:[%s2799_s1 + $0x10] sm:$0xff]  ;;  %v762_v9 = vld [vmem:[%s2799_s1] sm:$0xff]  ;;  %vm825_vm2 = vcmask 1041408   ;;  %v2623_v14 = vmov 1   ;;  %v2624_v15 = vmov 3  }
  0x27   : > { %784 = vperm.xlu1 %2454, %v765_v2   ;;  %774 = vperm.xlu0 %2453, %v763_v3   ;;  %v714_v10 = vld [vmem:[%s2804_s29 + $0x10] sm:$0xff]  ;;  %v715_v11 = vld [vmem:[%s2804_s29 + $0x18] sm:$0xff]  ;;  %v807_v12 = vld [vmem:[%s3482_s7 + $0x8] sm:$0x3]  ;;  %v2625_v16 = vmov 2   ;;  %s3518_s4 = sld [smem:[#allocation18_spill]] }
  0x28   : > { %2369 = vmatpush.msk.msra.mxu1 %vm825_vm2, %v807_v12  ;;  %v806_v13 = vld [vmem:[%s3482_s7] sm:$0xff]  ;;  %2455 = vset.pattern.permute.xlu2 %v2623_v14  ;;  %vm812_vm3 = vcmask 80896   ;;  %s2626_s3 = smov 96   ;;  %s2627_s30 = smov 112   ;;  %vm1038_vm4 = vcmask 261120  }
  0x29   : > { %v2471_v18 = vld [vmem:[%s3481_s6] ss:$0 sm:$0xff]  ;;  %s2628_s5 = smov 80   ;;  %p2320_p8 = scmp.ne.s32.totalorder %s2603_s2, 1 }
  0x2a   : > { %2370 = vmatpush.msra.mxu1 %v806_v13  ;;  %v2472_v42 = vld [vmem:[%s3483_s8] ss:$0 sm:$0xff]  ;;  %s3519_s28 = sld [smem:[#allocation13_spill]] (!%p2320_p8) }
  0x2b   : > { %v717_v1 = vld [vmem:[%s3517_s26 + $0x8] sm:$0xff]  ;;  %v716_v5 = vld [vmem:[%s3517_s26] sm:$0xff] }
  0x2c   : > { %745 = vmatpush.msra.mxu0 %v717_v1  ;;  %2367 = vmatpush.msra.mxu3 %v717_v1 }
  0x2d   : > { %v2470_v17 = vld [vmem:[%s3518_s4] ss:$0 sm:$0xff] }
  0x2e   : > { %746 = vmatpush.msra.mxu0 %v716_v5  ;;  %2368 = vmatpush.msra.mxu3 %v716_v5 }
  0x2f   : > { %2309 = vmatmul.msk.f32.vlgmr.msra.gmra.mxu0 %vm718_vm1, %v712_v6  ;;  %2310 = vmatmul.msk.f32.vlgmr.msra.gmra.mxu3 %vm718_vm1, %v713_v7 }
  0x30   : > { %779 = vperm.xlu0 %2453, %v764_v8   ;;  %769 = vperm.xlu1 %2454, %v762_v9   ;;  %v1002_v8 = vld [vmem:[%s2809_s0] sm:$0xff]  ;;  %v1003_v9 = vld [vmem:[%s2809_s0 + $0x8] sm:$0xff] }
  0x31   : > { %2313 = vmatpush.msk.msrb.mxu0 %vm825_vm2, %v807_v12 }
  0x33   : > { %844 = vmatpush.msrb.mxu0 %v806_v13  ;;  %v1005_v13 = vld [vmem:[%s2809_s0 + $0x18] sm:$0xff] }
  0x37   : > { %2311 = vmatmul.msk.f32.gmra.mxu3 %vm718_vm1, %v714_v10 }
  0x38   : > { %2457 = vset.pattern.permute.xlu1 %v2624_v15  ;;  %2459 = vset.pattern.permute.xlu0 %v2625_v16 }
  0x3f   : > { %2312 = vmatmul.msk.f32.gmra.mxu3 %vm718_vm1, %v715_v11  ;;  %v1004_v11 = vld [vmem:[%s2809_s0 + $0x10] sm:$0xff] }
  0x99   : > { %v785_v19 = vpop.permute.xlu1 %784  ;;  %v775_v20 = vpop.permute.xlu0 %774 }
  0x9a   : > { %v791_v21 = vmul.f32 %v2470_v17, %v775_v20  ;;  %v793_v30 = vmul.f32 %v2470_v17, %v785_v19 }
  0x9c   : > { %v799_v22 = vadd.f32 %v2471_v18, %v791_v21  ;;  %v801_v34 = vadd.f32 %v2471_v18, %v793_v30 }
  0x9e   : > { %v803_v23 = vmax.f32 %v799_v22, 0.0  ;;  %v805_v36 = vmax.f32 %v801_v34, 0.0 }
  0xa0   : > { %2315 = vmatmul.msk.f32.vlgmr.msra.gmra.mxu1 %vm812_vm3, %v803_v23 }
  0xa2   : > { %v780_v24 = vpop.permute.xlu0 %779  ;;  %v770_v25 = vpop.permute.xlu1 %769 }
  0xa3   : > { %v792_v26 = vmul.f32 %v2470_v17, %v780_v24  ;;  %v790_v27 = vmul.f32 %v2470_v17, %v770_v25 }
  0xa5   : > { %v800_v28 = vadd.f32 %v2471_v18, %v792_v26  ;;  %v798_v29 = vadd.f32 %v2471_v18, %v790_v27 }
  0xa7   : > { %v804_v31 = vmax.f32 %v800_v28, 0.0  ;;  %v802_v32 = vmax.f32 %v798_v29, 0.0 }
  0xa9   : > { %2314 = vmatmul.msk.f32.vlgmr.msrb.gmra.mxu0 %vm812_vm3, %v802_v32  ;;  %2316 = vmatmul.msk.f32.gmra.mxu1 %vm812_vm3, %v804_v31 }
  0xac   : > { %v748_v33 = vpop.f32.mrf.mxu0 }
  0xad   : > { %963 = vperm.xlu1 %2457, %v748_v33   ;;  %883 = vperm.xlu2 %2455, %v748_v33  }
  0xb1   : > { %2317 = vmatmul.msk.f32.gmra.mxu1 %vm812_vm3, %v805_v36 }
  0xb2   : > { %v751_v35 = vpop.f32.mrf.mxu3 }
  0xb3   : > { %927 = vperm.xlu0 %2459, %v751_v35  }
  0xb5   : > { %2458 = vset.pattern.permute.xlu1 %v2623_v14  ;;  %2456 = vset.pattern.permute.xlu2 %v2625_v16 }
  0xb6   : > { %887 = vperm.xlu1 %2458, %v751_v35   ;;  %923 = vperm.xlu2 %2456, %v748_v33  }
  0xba   : > { %v754_v37 = vpop.f32.mrf.mxu3 }
  0xbb   : > { %2460 = vset.pattern.permute.xlu0 %v2624_v15 }
  0xbc   : > { %967 = vperm.xlu0 %2460, %v751_v35  }
  0xbe   : > { %2463 = vset.pattern.permute.xlu1 %v2624_v15  ;;  %2461 = vset.pattern.permute.xlu2 %v2623_v14 }
  0xbf   : > { %971 = vperm.xlu1 %2463, %v754_v37   ;;  %891 = vperm.xlu2 %2461, %v754_v37  }
  0xc2   : > { %v757_v38 = vpop.f32.mrf.mxu3 }
  0xc4   : > { %2465 = vset.pattern.permute.xlu0 %v2625_v16 }
  0xc5   : > { %935 = vperm.xlu0 %2465, %v757_v38  }
  0xc7   : > { %975 = vperm.xlu1 %2463, %v757_v38   ;;  %2462 = vset.pattern.permute.xlu2 %v2625_v16 }
  0xc8   : > { %931 = vperm.xlu2 %2462, %v754_v37  }
  0xcd   : > { %2467 = vset.pattern.permute.xlu0 %v2622_v4 }
  0xce   : > { %865 = vperm.xlu0 %2467, %v751_v35  }
  0xcf   : > { %2466 = vset.pattern.permute.xlu1 %v2622_v4 }
  0xd0   : > { %870 = vperm.xlu1 %2466, %v754_v37   ;;  %2464 = vset.pattern.permute.xlu2 %v2623_v14 }
  0xd1   : > { %895 = vperm.xlu2 %2464, %v757_v38  }
  0xd6   : > { %2469 = vset.pattern.permute.xlu0 %v2624_v15 }
  0xd8   : > { %860 = vperm.xlu1 %2466, %v748_v33  }
  0xd9   : > { %2468 = vset.pattern.permute.xlu2 %v2622_v4 }
  0xda   : > { %875 = vperm.xlu2 %2468, %v757_v38  }
 0x107   : > { %v884_v39 = vpop.permute.xlu2 %883 }
 0x110   : > { %v924_v40 = vpop.permute.xlu2 %923 }
 0x119   : > { %v892_v43 = vpop.permute.xlu2 %891 }
 0x11d   : > { %v849_v44 = vpop.f32.mrf.mxu1 }
 0x11e   : > { %v2855_v45 = vadd.f32 %v2472_v42, %v849_v44 }
 0x11f   : > { %v964_v41 = vpop.permute.xlu1 %963 }
 0x122   : > { %v932_v53 = vpop.permute.xlu2 %931 }
 0x125   : > { %v928_v46 = vpop.permute.xlu0 %927 }
 0x126   : > { %v939_v47 = vmul.f32 %v928_v46, %v2855_v45  ;;  %v852_v50 = vpop.f32.mrf.mxu1  ;;  %v846_v51 = vpop.f32.mrf.mxu0  ;;  %v760_v46 = vld [vmem:[#allocation2] sm:$0xff] }
 0x127   : > { %v853_v52 = vadd.f32 %v2472_v42, %v852_v50  ;;  %v847_v54 = vadd.f32 %v2472_v42, %v846_v51 }
 0x128   : > { %948 = vrot.lane.b32.xlu0 %v939_v47, %s2626_s3  ;;  %v888_v48 = vpop.permute.xlu1 %887 }
 0x129   : > { %v899_v49 = vmul.f32 %v888_v48, %v2855_v45  ;;  %v900_v55 = vmul.f32 %v892_v43, %v853_v52  ;;  %v940_v56 = vmul.f32 %v932_v53, %v853_v52  ;;  %v898_v58 = vmul.f32 %v884_v39, %v847_v54 }
 0x12a   : > { %v938_v63 = vmul.f32 %v924_v40, %v847_v54  ;;  %v978_v6 = vmul.f32 %v964_v41, %v847_v54 }
 0x12b   : > { %908 = vrot.lane.b32.xlu2 %v899_v49, %s2627_s30  ;;  %910 = vrot.lane.b32.xlu1 %v900_v55, %s2627_s30  ;;  %v896_v3 = vpop.permute.xlu2 %895  ;;  %v761_v49 = vld [vmem:[#allocation2 + $0x8] sm:$0xff] }
 0x12e   : > { %v968_v59 = vpop.permute.xlu0 %967  ;;  %v855_v62 = vpop.f32.mrf.mxu1 }
 0x12f   : > { %v979_v60 = vmul.f32 %v968_v59, %v2855_v45  ;;  %v856_v1 = vadd.f32 %v2472_v42, %v855_v62 }
 0x130   : > { %950 = vrot.lane.b32.xlu0 %v940_v56, %s2626_s3 }
 0x131   : > { %v972_v57 = vpop.permute.xlu1 %971  ;;  %v901_v4 = vmul.f32 %v896_v3, %v856_v1 }
 0x132   : > { %v980_v61 = vmul.f32 %v972_v57, %v853_v52 }
 0x133   : > { %906 = vrot.lane.b32.xlu2 %v898_v58, %s2627_s30 }
 0x134   : > { %990 = vrot.lane.b32.xlu1 %v980_v61, %s2628_s5  ;;  %v876_v10 = vpop.permute.xlu2 %875 }
 0x135   : > { %v881_v24 = vmul.f32 %v876_v10, %v856_v1 }
 0x137   : > { %v936_v5 = vpop.permute.xlu0 %935 }
 0x138   : > { %988 = vrot.lane.b32.xlu0 %v979_v60, %s2628_s5  ;;  %v941_v7 = vmul.f32 %v936_v5, %v856_v1 }
 0x139   : > { %v976_v0 = vpop.permute.xlu1 %975 }
 0x13a   : > { %v981_v2 = vmul.f32 %v976_v0, %v856_v1 }
 0x13b   : > { %946 = vrot.lane.b32.xlu2 %v938_v63, %s2626_s3 }
 0x13c   : > { %992 = vrot.lane.b32.xlu1 %v981_v2, %s2628_s5 }
 0x140   : > { %v866_v16 = vpop.permute.xlu0 %865 }
 0x141   : > { %v879_v29 = vmul.f32 %v866_v16, %v2855_v45 }
 0x142   : > { %v871_v14 = vpop.permute.xlu1 %870 }
 0x143   : > { %912 = vrot.lane.b32.xlu2 %v901_v4, %s2627_s30  ;;  %v880_v25 = vmul.f32 %v871_v14, %v853_v52 }
 0x144   : > { %986 = vrot.lane.b32.xlu1 %v978_v6, %s2628_s5 }
 0x14a   : > { %v861_v17 = vpop.permute.xlu1 %860 }
 0x14b   : > { %952 = vrot.lane.b32.xlu2 %v941_v7, %s2626_s3  ;;  %v878_v36 = vmul.f32 %v861_v17, %v847_v54 }
 0x171   : > { %1006 = vxpose.xlu2.b32.start [1/4] (short) (narrow) %v1002_v8, 16 }
 0x179   : > { %1007 = vxpose.xlu2.b32.cont [2/4] (short) (narrow) %v1003_v9, 16 }
 0x181   : > { %1008 = vxpose.xlu2.b32.cont [3/4] (short) (narrow) %v1004_v11, 16 }
 0x185   : > { %v909_v12 = vpop.permute.xlu2 %908 }
 0x186   : > { %v919_v32 = vadd.f32 %v909_v12, %v879_v29 }
 0x189   : > { %1009 = vxpose.xlu2.b32.end [4/4] (short) (narrow) %v1005_v13, 16 }
 0x18d   : > { %v907_v15 = vpop.permute.xlu2 %906 }
 0x18e   : > { %v918_v39 = vadd.f32 %v907_v15, %v878_v36 }
 0x195   : > { %v947_v18 = vpop.permute.xlu2 %946 }
 0x196   : > { %v958_v41 = vadd.f32 %v947_v18, %v918_v39 }
 0x19a   : > { %v949_v19 = vpop.permute.xlu0 %948 }
 0x19b   : > { %v959_v37 = vadd.f32 %v949_v19, %v919_v32 }
 0x19d   : > { %v911_v20 = vpop.permute.xlu1 %910  ;;  %v913_v21 = vpop.permute.xlu2 %912 }
 0x19e   : > { %v921_v27 = vadd.f32 %v913_v21, %v881_v24  ;;  %v920_v28 = vadd.f32 %v911_v20, %v880_v25 }
 0x1a2   : > { %v951_v22 = vpop.permute.xlu0 %950 }
 0x1a3   : > { %v960_v33 = vadd.f32 %v951_v22, %v920_v28 }
 0x1a5   : > { %v953_v26 = vpop.permute.xlu2 %952 }
 0x1a6   : > { %v991_v23 = vpop.permute.xlu1 %990  ;;  %v961_v30 = vadd.f32 %v953_v26, %v921_v27 }
 0x1a7   : > { %v1000_v38 = vadd.f32 %v991_v23, %v960_v33 }
 0x1aa   : > { %v989_v35 = vpop.permute.xlu0 %988 }
 0x1ab   : > { %v999_v40 = vadd.f32 %v989_v35, %v959_v37 }
 0x1ae   : > { %v993_v31 = vpop.permute.xlu1 %992 }
 0x1af   : > { %v1001_v34 = vadd.f32 %v993_v31, %v961_v30 }
 0x1b1   : > { %1057 = vmatpush.msra.mxu2 %v1001_v34 }
 0x1b3   : > { %1058 = vmatpush.msra.mxu2 %v1000_v38 }
 0x1b5   : > { %1059 = vmatpush.msra.mxu2 %v999_v40 }
 0x1b6   : > { %v987_v42 = vpop.permute.xlu1 %986 }
 0x1b7   : > { %v998_v43 = vadd.f32 %v987_v42, %v958_v41 }
 0x1b9   : > { %1060 = vmatpush.msra.mxu2 %v998_v43 }
 0x20a   : > { %v1022_v44 = vpop.trf.xlu2 }
 0x20b   : > { %2318 = vmatmul.msk.f32.vlgmr.msra.gmra.mxu2 %vm1038_vm4, %v1022_v44 }
 0x212   : > { %v1023_v45 = vpop.trf.xlu2 }
 0x213   : > { %2319 = vmatmul.msk.f32.gmra.mxu2 %vm1038_vm4, %v1023_v45 }
 0x28e   : > { %v1062_v47 = vpop.f32.mrf.mxu2 }
 0x28f   : > { %v1068_v48 = vadd.f32 %v1062_v47, %v760_v46 }
 0x291   : > { %1070 = vst.msk [vmem:[#allocation2] sm:$0xff] %vm718_vm1, %v1068_v48 }
 0x295   : > { %1075 = sbr.rel (%p2320_p8) target bundleno = 812 (0x32c), region = 116 }
 0x296   : > { %v1065_v50 = vpop.f32.mrf.mxu2 }
 0x297   : > { %v1069_v51 = vadd.f32 %v1065_v50, %v761_v49 }
 0x299   : > { %1071 = vst.msk [vmem:[#allocation2 + $0x8] sm:$0xff] %vm718_vm1, %v1069_v51 }
 0x29a   : > { %v1080_v52 = vld [vmem:[%s3484_s9] sm:$0xf]  ;;  %vm1088_vm5 = vcmask 1043456   ;;  %vm1081_vm6 = vcmask 31744   ;;  %v1079_v54 = vld [vmem:[%s3519_s28 + $0x8] sm:$0xff] }
 0x29b   : > { %v1078_v53 = vld [vmem:[%s3519_s28] sm:$0xff]  ;;  %2321 = vmatpush.msk.msra.mxu0 %vm1088_vm5, %v1080_v52  ;;  %2371 = vmatpush.msk.msra.mxu1 %vm1088_vm5, %v1080_v52 }
 0x29c   : > { %2322 = vmatmul.msk.f32.vlgmr.msra.gmra.mxu0 %vm1081_vm6, %v1078_v53  ;;  %2323 = vmatmul.msk.f32.vlgmr.msra.gmra.mxu1 %vm1081_vm6, %v1079_v54  ;;  %v1076_v55 = vld [vmem:[#allocation2] sm:$0xff] }
 0x29d   : > { %v2473_v57 = vld [vmem:[%s3485_s10] ss:$0 sm:$0xff] }
 0x2a0   : > { %v1077_v56 = vld [vmem:[#allocation2 + $0x8] sm:$0xff] }
 0x319   : > { %v1109_v58 = vpop.f32.mrf.mxu0  ;;  %v1112_v59 = vpop.f32.mrf.mxu1 }
 0x31a   : > { %v1115_v60 = vadd.f32 %v1109_v58, %v1076_v55  ;;  %v1116_v61 = vadd.f32 %v1112_v59, %v1077_v56 }
 0x31c   : > { %v1121_v62 = vadd.f32 %v2473_v57, %v1115_v60  ;;  %v1122_v63 = vadd.f32 %v2473_v57, %v1116_v61 }
 0x31e   : > { %v1125_v0 = vmul.f32 1.442695, %v1121_v62  ;;  %v1127_v1 = vmul.f32 1.442695, %v1122_v63  ;;  %vm1123_vm7 = vcmp.gt.f32.partialorder %v1121_v62, 0.0  ;;  %vm1124_vm8 = vcmp.gt.f32.partialorder %v1122_v63, 0.0 }
 0x320   : > { %2474 = vpow2.f32 %v1125_v0 }
 0x321   : > { %2476 = vpow2.f32 %v1127_v1 }
 0x326   : > { %v2475_v2 = vpop.eup %2474 }
 0x327   : > { %v2477_v3 = vpop.eup %2476  ;;  %v2324_v4 = vadd.f32 -1.0, %v2475_v2 }
 0x328   : > { %v2325_v5 = vadd.f32 -1.0, %v2477_v3 }
 0x329   : > { %v1131_v6 = vsel %vm1123_vm7, %v1121_v62, %v2324_v4 }
 0x32a   : > { %1133 = vst.msk [vmem:[#allocation4] sm:$0xff] %vm718_vm1, %v1131_v6  ;;  %v1132_v7 = vsel %vm1124_vm8, %v1122_v63, %v2325_v5 }
 0x32b   : > { %1134 = vst.msk [vmem:[#allocation4 + $0x8] sm:$0xff] %vm718_vm1, %v1132_v7 }
 0x32c PF: > { %p2326_p9 = scmp.ne.s32.totalorder %s2607_s25, 1 }
 0x32d   : > { %p2327_p10 = scmp.ne.s32.totalorder (!%p2326_p9), %s2603_s2, 0 }
 0x32e   : > { %1138 = sbr.rel (%p2326_p9) target bundleno = 2455 (0x997), region = 120 }
 0x333   : > { %1142 = sbr.rel (%p2327_p10) target bundleno = 827 (0x33b), region = 124 }
 0x338   : > { %vm1143_vm9 = vcmask 261120   ;;  %v2629_v8 = vmov 0.0  }
 0x339   : > { %1144 = vst.msk [vmem:[#allocation3] sm:$0xff] %vm1143_vm9, %v2629_v8 }
 0x33a   : > { %1145 = vst.msk [vmem:[#allocation3 + $0x8] sm:$0xff] %vm1143_vm9, %v2629_v8 }
 0x33b PF: > { %v1151_v9 = vld [vmem:[#allocation4 + $0x8] sm:$0xff]  ;;  %v1196_v10 = vld [vmem:[%s2799_s1] sm:$0xff]  ;;  %v2630_v12 = vmov 0   ;;  %vm1152_vm10 = vcmask 130048   ;;  %v1198_v15 = vld [vmem:[%s2799_s1 + $0x10] sm:$0xff]  ;;  %vm1271_vm11 = vcmask 1041408  }
 0x33c   : > { %v1150_v11 = vld [vmem:[#allocation4] sm:$0xff]  ;;  %2478 = vset.pattern.permute.xlu0 %v2630_v12  ;;  %1179 = vmatpush.msra.mxu0 %v1151_v9  ;;  %v1147_v14 = vld [vmem:[%s2804_s29 + $0x8] sm:$0xff]  ;;  %v1149_v16 = vld [vmem:[%s2804_s29 + $0x18] sm:$0xff]  ;;  %v2631_v24 = vmov 5   ;;  %v2632_v27 = vmov 1   ;;  %vm1258_vm12 = vcmask 80896  }
 0x33d   : > { %v1146_v13 = vld [vmem:[%s2804_s29] sm:$0xff]  ;;  %2372 = vmatpush.msra.mxu2 %v1151_v9  ;;  %1203 = vperm.xlu0 %2478, %v1196_v10   ;;  %v1197_v17 = vld [vmem:[%s2799_s1 + $0x8] sm:$0xff]  ;;  %v1199_v18 = vld [vmem:[%s2799_s1 + $0x18] sm:$0xff]  ;;  %v2633_v46 = vmov 6   ;;  %v2634_v48 = vmov 2   ;;  %v2635_v50 = vmov 7  }
 0x33e   : > { %1180 = vmatpush.msra.mxu0 %v1150_v11  ;;  %2479 = vset.pattern.permute.xlu1 %v2630_v12  ;;  %v1148_v19 = vld [vmem:[%s2804_s29 + $0x10] sm:$0xff]  ;;  %v1244_v20 = vld [vmem:[%s3488_s13 + $0x20] sm:$0x3]  ;;  %v1245_v21 = vld [vmem:[%s3488_s13 + $0x28] sm:$0x3]  ;;  %v2636_v51 = vmov 3  }
 0x33f   : > { %2374 = vmatpush.msra.mxu2 %v1150_v11  ;;  %2328 = vmatmul.msk.f32.vlgmr.msra.gmra.mxu0 %vm1152_vm10, %v1146_v13  ;;  %v1240_v22 = vld [vmem:[%s3488_s13] sm:$0xff]  ;;  %v1241_v23 = vld [vmem:[%s3488_s13 + $0x8] sm:$0xff]  ;;  %v1246_v25 = vld [vmem:[%s3488_s13 + $0x30] sm:$0x3]  ;;  %v2637_v52 = vmov 8   ;;  %v2638_v53 = vmov 4  }
 0x340   : > { %2329 = vmatmul.msk.f32.vlgmr.msra.gmra.mxu2 %vm1152_vm10, %v1147_v14  ;;  %1213 = vperm.xlu1 %2479, %v1198_v15   ;;  %v1242_v26 = vld [vmem:[%s3488_s13 + $0x10] sm:$0xff]  ;;  %v2534_v28 = vld [vmem:[%s3486_s11] ss:$0 sm:$0xff]  ;;  %v1247_v56 = vld [vmem:[%s3488_s13 + $0x38] sm:$0x3]  ;;  %v2639_v58 = vmov 9  }
 0x341   : > { %2373 = vmatpush.msra.mxu3 %v1151_v9  ;;  %2480 = vset.pattern.permute.xlu2 %v2630_v12  ;;  %v2535_v29 = vld [vmem:[%s3487_s12] ss:$0 sm:$0xff]  ;;  %v1243_v57 = vld [vmem:[%s3488_s13 + $0x18] sm:$0xff]  ;;  %v2640_v60 = vmov 10   ;;  %v2641_v62 = vmov 11   ;;  %v2642_v1 = vmov 15  }
 0x342   : > { %2332 = vmatpush.msk.msra.mxu1 %vm1271_vm11, %v1244_v20  ;;  %2337 = vmatpush.msk.msrb.mxu2 %vm1271_vm11, %v1245_v21  ;;  %v3060_v0 = vld [vmem:[%s3489_s14] sm:$0xf]  ;;  %s2645_s4 = smov 96   ;;  %s2646_s28 = smov 64   ;;  %vm2012_vm13 = vcmask 261120  }
 0x343   : > { %2375 = vmatpush.msra.mxu3 %v1150_v11  ;;  %2347 = vmatpush.msk.msrb.mxu0 %vm1271_vm11, %v1247_v56  ;;  %v3067_v3 = vperm.slane %v3060_v0, 0  ;;  %v3079_v7 = vperm.slane %v3060_v0, 1  ;;  %s2647_s26 = smov 32   ;;  %p2354_p11 = scmp.ne.s32.totalorder %s2603_s2, 1 }
 0x344   : > { %2331 = vmatmul.msk.f32.vlgmr.msra.gmra.mxu3 %vm1152_vm10, %v1149_v16  ;;  %1299 = vmatpush.msra.mxu1 %v1240_v22 }
 0x345   : > { %1208 = vperm.xlu0 %2478, %v1197_v17   ;;  %1328 = vmatpush.msrb.mxu2 %v1241_v23 }
 0x346   : > { %2342 = vmatpush.msk.msrb.mxu3 %vm1271_vm11, %v1246_v25  ;;  %1386 = vmatpush.msrb.mxu0 %v1243_v57 }
 0x348   : > { %1218 = vperm.xlu1 %2479, %v1199_v18   ;;  %2330 = vmatmul.msk.f32.gmra.mxu2 %vm1152_vm10, %v1148_v19 }
 0x349   : > { %1357 = vmatpush.msrb.mxu3 %v1242_v26 }
 0x34d   : > { %2492 = vset.pattern.permute.xlu0 %v2632_v27 }
 0x350   : > { %2485 = vset.pattern.permute.xlu1 %v2631_v24 }
 0x3af   : > { %v1204_v30 = vpop.permute.xlu0 %1203 }
 0x3b0   : > { %v1224_v31 = vmul.f32 %v2534_v28, %v1204_v30 }
 0x3b2   : > { %v1232_v32 = vadd.f32 %v2535_v29, %v1224_v31  ;;  %v1214_v35 = vpop.permute.xlu1 %1213 }
 0x3b3   : > { %v1226_v38 = vmul.f32 %v2534_v28, %v1214_v35 }
 0x3b4   : > { %v2932_v33 = vmax.f32 %v1232_v32, 0.0 }
 0x3b5   : > { %v1234_v41 = vadd.f32 %v2535_v29, %v1226_v38 }
 0x3b6   : > { %2333 = vmatmul.msk.f32.vlgmr.msra.gmra.mxu1 %vm1258_vm12, %v2932_v33  ;;  %2338 = vmatmul.msk.f32.vlgmr.msrb.gmra.mxu2 %vm1258_vm12, %v2932_v33 }
 0x3b7   : > { %2343 = vmatmul.msk.f32.vlgmr.msrb.gmra.mxu3 %vm1258_vm12, %v2932_v33  ;;  %v1209_v34 = vpop.permute.xlu0 %1208  ;;  %v2954_v44 = vmax.f32 %v1234_v41, 0.0  ;;  %2348 = vmatmul.msk.f32.vlgmr.msrb.gmra.mxu0 %vm1258_vm12, %v2932_v33 }
 0x3b8   : > { %v1225_v36 = vmul.f32 %v2534_v28, %v1209_v34  ;;  %v2643_v34 = vmov 13  }
 0x3ba   : > { %v1233_v37 = vadd.f32 %v2535_v29, %v1225_v36  ;;  %v1219_v42 = vpop.permute.xlu1 %1218 }
 0x3bb   : > { %v1227_v45 = vmul.f32 %v2534_v28, %v1219_v42 }
 0x3bc   : > { %v2940_v39 = vpop.f32.mrf.mxu0  ;;  %v2942_v40 = vmax.f32 %v1233_v37, 0.0 }
 0x3bd   : > { %1569 = vperm.xlu1 %2485, %v2940_v39   ;;  %1402 = vperm.xlu2 %2480, %v2940_v39   ;;  %v1235_v47 = vadd.f32 %v2535_v29, %v1227_v45 }
 0x3be   : > { %2334 = vmatmul.msk.f32.gmra.mxu1 %vm1258_vm12, %v2942_v40  ;;  %2339 = vmatmul.msk.f32.gmra.mxu2 %vm1258_vm12, %v2942_v40 }
 0x3bf   : > { %2344 = vmatmul.msk.f32.gmra.mxu3 %vm1258_vm12, %v2942_v40  ;;  %v1239_v49 = vmax.f32 %v1235_v47, 0.0  ;;  %2349 = vmatmul.msk.f32.gmra.mxu0 %vm1258_vm12, %v2942_v40 }
 0x3c3   : > { %v2952_v43 = vpop.f32.mrf.mxu2 }
 0x3c4   : > { %1429 = vperm.xlu0 %2492, %v2952_v43  }
 0x3c5   : > { %2486 = vset.pattern.permute.xlu1 %v2633_v46  ;;  %2481 = vset.pattern.permute.xlu2 %v2632_v27 }
 0x3c6   : > { %1609 = vperm.xlu1 %2486, %v2940_v39   ;;  %1425 = vperm.xlu2 %2481, %v2940_v39  }
 0x3c7   : > { %2335 = vmatmul.msk.f32.gmra.mxu1 %vm1258_vm12, %v2954_v44  ;;  %2340 = vmatmul.msk.f32.gmra.mxu2 %vm1258_vm12, %v2954_v44  ;;  %v2983_v54 = vpop.f32.mrf.mxu3 }
 0x3c8   : > { %2345 = vmatmul.msk.f32.gmra.mxu3 %vm1258_vm12, %v2954_v44  ;;  %2350 = vmatmul.msk.f32.gmra.mxu0 %vm1258_vm12, %v2954_v44 }
 0x3cb   : > { %v2990_v55 = vpop.f32.mrf.mxu2 }
 0x3cc   : > { %2494 = vset.pattern.permute.xlu0 %v2634_v48 }
 0x3cd   : > { %1469 = vperm.xlu0 %2494, %v2952_v43  }
 0x3ce   : > { %2487 = vset.pattern.permute.xlu1 %v2635_v50  ;;  %2482 = vset.pattern.permute.xlu2 %v2634_v48 }
 0x3cf   : > { %1649 = vperm.xlu1 %2487, %v2940_v39   ;;  %1465 = vperm.xlu2 %2482, %v2940_v39  }
 0x3d0   : > { %2336 = vmatmul.msk.f32.gmra.mxu1 %vm1258_vm12, %v1239_v49  ;;  %2341 = vmatmul.msk.f32.gmra.mxu2 %vm1258_vm12, %v1239_v49 }
 0x3d1   : > { %2346 = vmatmul.msk.f32.gmra.mxu3 %vm1258_vm12, %v1239_v49  ;;  %2351 = vmatmul.msk.f32.gmra.mxu0 %vm1258_vm12, %v1239_v49 }
 0x3d5   : > { %2496 = vset.pattern.permute.xlu0 %v2636_v51 }
 0x3d6   : > { %1509 = vperm.xlu0 %2496, %v2952_v43  }
 0x3d7   : > { %2488 = vset.pattern.permute.xlu1 %v2637_v52  ;;  %2483 = vset.pattern.permute.xlu2 %v2636_v51 }
 0x3d8   : > { %1689 = vperm.xlu1 %2488, %v2940_v39   ;;  %1505 = vperm.xlu2 %2483, %v2940_v39  }
 0x3de   : > { %2498 = vset.pattern.permute.xlu0 %v2638_v53 }
 0x3df   : > { %1549 = vperm.xlu0 %2498, %v2952_v43  }
 0x3e0   : > { %2491 = vset.pattern.permute.xlu1 %v2630_v12  ;;  %2484 = vset.pattern.permute.xlu2 %v2638_v53 }
 0x3e1   : > { %1417 = vperm.xlu1 %2491, %v2983_v54   ;;  %1545 = vperm.xlu2 %2484, %v2940_v39  }
 0x3e7   : > { %2509 = vset.pattern.permute.xlu0 %v2630_v12 }
 0x3e8   : > { %1412 = vperm.xlu0 %2509, %v2990_v55  }
 0x3e9   : > { %2501 = vset.pattern.permute.xlu1 %v2631_v24  ;;  %2489 = vset.pattern.permute.xlu2 %v2639_v58 }
 0x3ea   : > { %1581 = vperm.xlu1 %2501, %v2983_v54   ;;  %1713 = vperm.xlu2 %2489, %v2940_v39  }
 0x3f0   : > { %2514 = vset.pattern.permute.xlu0 %v2631_v24 }
 0x3f1   : > { %1577 = vperm.xlu0 %2514, %v2990_v55  }
 0x3f2   : > { %2503 = vset.pattern.permute.xlu1 %v2633_v46  ;;  %2490 = vset.pattern.permute.xlu2 %v2630_v12 }
 0x3f3   : > { %1621 = vperm.xlu1 %2503, %v2983_v54   ;;  %1407 = vperm.xlu2 %2490, %v2952_v43  }
 0x3f9   : > { %2515 = vset.pattern.permute.xlu0 %v2633_v46 }
 0x3fa   : > { %1617 = vperm.xlu0 %2515, %v2990_v55  }
 0x3fb   : > { %2505 = vset.pattern.permute.xlu1 %v2635_v50  ;;  %2493 = vset.pattern.permute.xlu2 %v2632_v27 }
 0x3fc   : > { %1661 = vperm.xlu1 %2505, %v2983_v54   ;;  %1437 = vperm.xlu2 %2493, %v2983_v54  }
 0x402   : > { %2516 = vset.pattern.permute.xlu0 %v2635_v50 }
 0x403   : > { %1657 = vperm.xlu0 %2516, %v2990_v55  }
 0x404   : > { %2507 = vset.pattern.permute.xlu1 %v2637_v52  ;;  %2495 = vset.pattern.permute.xlu2 %v2634_v48 }
 0x405   : > { %1701 = vperm.xlu1 %2507, %v2983_v54   ;;  %1477 = vperm.xlu2 %2495, %v2983_v54  }
 0x40b   : > { %2517 = vset.pattern.permute.xlu0 %v2637_v52 }
 0x40c   : > { %1697 = vperm.xlu0 %2517, %v2990_v55  }
 0x40d   : > { %2508 = vset.pattern.permute.xlu1 %v2639_v58  ;;  %2497 = vset.pattern.permute.xlu2 %v2636_v51 }
 0x40e   : > { %1717 = vperm.xlu1 %2508, %v2952_v43   ;;  %1517 = vperm.xlu2 %2497, %v2983_v54  }
 0x414   : > { %2518 = vset.pattern.permute.xlu0 %v2639_v58 }
 0x415   : > { %1725 = vperm.xlu0 %2518, %v2983_v54  }
 0x416   : > { %2510 = vset.pattern.permute.xlu1 %v2632_v27  ;;  %2499 = vset.pattern.permute.xlu2 %v2638_v53 }
 0x417   : > { %1433 = vperm.xlu1 %2510, %v2990_v55   ;;  %1557 = vperm.xlu2 %2499, %v2983_v54   ;;  %v1403_v59 = vpop.permute.xlu2 %1402 }
 0x41d   : > { %2521 = vset.pattern.permute.xlu0 %v2640_v60 }
 0x41e   : > { %1757 = vperm.xlu0 %2521, %v2952_v43  }
 0x41f   : > { %2511 = vset.pattern.permute.xlu1 %v2634_v48  ;;  %2500 = vset.pattern.permute.xlu2 %v2631_v24  ;;  %v2644_v48 = vmov 14  }
 0x420   : > { %1473 = vperm.xlu1 %2511, %v2990_v55   ;;  %1573 = vperm.xlu2 %2500, %v2952_v43   ;;  %v3048_v61 = vpop.permute.xlu2 %1425 }
 0x426   : > { %2526 = vset.pattern.permute.xlu0 %v2641_v62 }
 0x427   : > { %1793 = vperm.xlu0 %2526, %v2940_v39  }
 0x428   : > { %2512 = vset.pattern.permute.xlu1 %v2636_v51  ;;  %2502 = vset.pattern.permute.xlu2 %v2633_v46  ;;  %v3165_v51 = vperm.slane %v3060_v0, 2 }
 0x429   : > { %1513 = vperm.xlu1 %2512, %v2990_v55   ;;  %1613 = vperm.xlu2 %2502, %v2952_v43   ;;  %v3055_v63 = vpop.permute.xlu2 %1465 }
 0x42f   : > { %2531 = vset.pattern.permute.xlu0 %v2642_v1  ;;  %v3063_v2 = vpop.permute.xlu1 %1569 }
 0x430   : > { %1949 = vperm.xlu0 %2531, %v2983_v54  }
 0x431   : > { %2513 = vset.pattern.permute.xlu1 %v2638_v53  ;;  %2504 = vset.pattern.permute.xlu2 %v2635_v50 }
 0x432   : > { %1553 = vperm.xlu1 %2513, %v2990_v55   ;;  %1653 = vperm.xlu2 %2504, %v2952_v43   ;;  %v3073_v4 = vpop.permute.xlu2 %1505 }
 0x433   : > { %v1301_v5 = vpop.f32.mrf.mxu1 }
 0x434   : > { %v3076_v6 = vadd.f32 %v1301_v5, %v3067_v3 }
 0x436   : > { %v3081_v8 = vpop.permute.xlu0 %1429  ;;  %v3084_v9 = vmul.f32 %v1403_v59, %v3076_v6  ;;  %v1440_v59 = vmul.f32 %v3048_v61, %v3076_v6 }
 0x438   : > { %1941 = vperm.xlu0 %2531, %v2952_v43   ;;  %v3087_v10 = vpop.permute.xlu1 %1609 }
 0x439   : > { %v1330_v11 = vpop.f32.mrf.mxu2 }
 0x43a   : > { %v3090_v12 = vadd.f32 %v1330_v11, %v3079_v7  ;;  %2523 = vset.pattern.permute.xlu1 %v2641_v62  ;;  %2506 = vset.pattern.permute.xlu2 %v2637_v52  ;;  %v1359_v33 = vpop.f32.mrf.mxu3 }
 0x43b   : > { %1797 = vperm.xlu1 %2523, %v2952_v43   ;;  %1693 = vperm.xlu2 %2506, %v2952_v43   ;;  %v1546_v13 = vpop.permute.xlu2 %1545  ;;  %v1304_v14 = vpop.f32.mrf.mxu1 }
 0x43c   : > { %v3096_v15 = vmul.f32 %v1546_v13, %v3090_v12  ;;  %v3113_v21 = vadd.f32 %v1304_v14, %v3067_v3  ;;  %v1520_v14 = vmul.f32 %v3073_v4, %v3076_v6 }
 0x43f   : > { %v3098_v16 = vpop.permute.xlu0 %1469 }
 0x441   : > { %v3100_v17 = vpop.permute.xlu1 %1649  ;;  %v1333_v24 = vpop.f32.mrf.mxu2 }
 0x442   : > { %v3123_v26 = vadd.f32 %v1333_v24, %v3079_v7  ;;  %v1362_v37 = vpop.f32.mrf.mxu3 }
 0x443   : > { %2527 = vset.pattern.permute.xlu1 %v2640_v60  ;;  %2519 = vset.pattern.permute.xlu2 %v2640_v60  ;;  %v3203_v24 = vadd.f32 %v1362_v37, %v3165_v51  ;;  %v1624_v37 = vmul.f32 %v3087_v10, %v3090_v12 }
 0x444   : > { %1761 = vperm.xlu1 %2527, %v2990_v55   ;;  %1765 = vperm.xlu2 %2519, %v2983_v54   ;;  %v3106_v18 = vpop.permute.xlu2 %1713  ;;  %v3108_v19 = vpop.f32.mrf.mxu1 }
 0x445   : > { %v3188_v5 = vadd.f32 %v3108_v19, %v3067_v3 }
 0x448   : > { %v3110_v20 = vpop.permute.xlu0 %1509 }
 0x44a   : > { %v3115_v22 = vpop.permute.xlu1 %1689  ;;  %v3146_v40 = vpop.f32.mrf.mxu2 }
 0x44b   : > { %v3151_v42 = vpop.f32.mrf.mxu3 }
 0x44c   : > { %2528 = vset.pattern.permute.xlu1 %v2641_v62  ;;  %2520 = vset.pattern.permute.xlu2 %v2641_v62 }
 0x44d   : > { %1801 = vperm.xlu1 %2528, %v2990_v55   ;;  %1805 = vperm.xlu2 %2520, %v2983_v54   ;;  %v1408_v23 = vpop.permute.xlu2 %1407  ;;  %v1310_v27 = vpop.f32.mrf.mxu1 }
 0x44e   : > { %v3120_v25 = vmul.f32 %v1408_v23, %v3113_v21  ;;  %v3126_v29 = vadd.f32 %v1310_v27, %v3067_v3  ;;  %v2648_v3 = vmov 12  }
 0x451   : > { %v1550_v28 = vpop.permute.xlu0 %1549 }
 0x452   : > { %v3129_v30 = vmul.f32 %v1550_v28, %v3123_v26  ;;  %v1584_v28 = vmul.f32 %v3063_v2, %v3090_v12 }
 0x453   : > { %v1418_v31 = vpop.permute.xlu1 %1417  ;;  %v1339_v45 = vpop.f32.mrf.mxu2 }
 0x454   : > { %v3132_v32 = vmul.f32 %v1418_v31, %v3126_v29  ;;  %v3161_v47 = vadd.f32 %v1339_v45, %v3079_v7  ;;  %v1368_v50 = vpop.f32.mrf.mxu3 }
 0x455   : > { %2529 = vset.pattern.permute.xlu1 %v2643_v34  ;;  %2522 = vset.pattern.permute.xlu2 %v2640_v60  ;;  %v3171_v53 = vadd.f32 %v1368_v50, %v3165_v51  ;;  %v1664_v50 = vmul.f32 %v3100_v17, %v3090_v12  ;;  %v3244_v12 = vadd.f32 %v3151_v42, %v3165_v51 }
 0x456   : > { %1865 = vperm.xlu1 %2529, %v2990_v55   ;;  %1753 = vperm.xlu2 %2522, %v2940_v39   ;;  %v3137_v35 = vpop.permute.xlu2 %1437  ;;  %v1521_v42 = vmul.f32 %v3110_v20, %v3113_v21 }
 0x45a   : > { %v3215_v31 = vpop.permute.xlu0 %1412 }
 0x45c   : > { %v3139_v36 = vpop.permute.xlu1 %1581 }
 0x45d   : > { %v1587_v20 = vmul.f32 %v3139_v36, %v3161_v47 }
 0x45e   : > { %1861 = vperm.xlu1 %2529, %v2952_v43   ;;  %2524 = vset.pattern.permute.xlu2 %v2639_v58 }
 0x45f   : > { %1721 = vperm.xlu2 %2524, %v2990_v55   ;;  %v3144_v38 = vpop.permute.xlu2 %1477 }
 0x465   : > { %v3148_v41 = vpop.permute.xlu1 %1621 }
 0x466   : > { %1857 = vperm.xlu1 %2529, %v2940_v39   ;;  %v1627_v36 = vmul.f32 %v3148_v41, %v3161_v47 }
 0x467   : > { %2525 = vset.pattern.permute.xlu2 %v2643_v34 }
 0x468   : > { %1869 = vperm.xlu2 %2525, %v2983_v54   ;;  %v3154_v44 = vpop.permute.xlu2 %1517 }
 0x46e   : > { %2532 = vset.pattern.permute.xlu1 %v2642_v1  ;;  %v3157_v46 = vpop.permute.xlu1 %1661  ;;  %v1480_v1 = vmul.f32 %v3055_v63, %v3076_v6  ;;  %v3198_v63 = vadd.f32 %v1359_v33, %v3165_v51 }
 0x46f   : > { %1945 = vperm.xlu1 %2532, %v2990_v55  }
 0x470   : > { %2530 = vset.pattern.permute.xlu2 %v2644_v48  ;;  %v1728_v27 = vmul.f32 %v3106_v18, %v3198_v63  ;;  %v1578_v48 = vpop.permute.xlu0 %1577 }
 0x471   : > { %1909 = vperm.xlu2 %2530, %v2983_v54   ;;  %v1558_v49 = vpop.permute.xlu2 %1557 }
 0x472   : > { %v3168_v52 = vmul.f32 %v1558_v49, %v3161_v47 }
 0x477   : > { %1937 = vperm.xlu1 %2532, %v2940_v39   ;;  %v1702_v56 = vpop.permute.xlu1 %1701 }
 0x478   : > { %v3175_v57 = vmul.f32 %v1702_v56, %v3171_v53  ;;  %v1618_v10 = vpop.permute.xlu0 %1617 }
 0x479   : > { %1905 = vperm.xlu2 %2530, %v2990_v55  }
 0x47a   : > { %v1574_v58 = vpop.permute.xlu2 %1573 }
 0x47b   : > { %v1585_v18 = vmul.f32 %v1574_v58, %v3123_v26 }
 0x47f   : > { %1448 = vrot.lane.b32.xlu1 %v1440_v59, %s2645_s4 }
 0x480   : > { %v3181_v60 = vpop.permute.xlu1 %1717 }
 0x481   : > { %1901 = vperm.xlu2 %2530, %v2952_v43  }
 0x483   : > { %v1614_v62 = vpop.permute.xlu2 %1613 }
 0x484   : > { %v1625_v45 = vmul.f32 %v1614_v62, %v3123_v26  ;;  %v1441_v62 = vmul.f32 %v3081_v8, %v3113_v21  ;;  %v1483_v8 = vmul.f32 %v3144_v38, %v3126_v29  ;;  %v1729_v38 = vmul.f32 %v3181_v60, %v3203_v24 }
 0x487   : > { %1488 = vrot.lane.b32.xlu1 %v1480_v1, %s2646_s28  ;;  %v1443_v1 = vmul.f32 %v3137_v35, %v3126_v29 }
 0x489   : > { %v1434_v11 = vpop.permute.xlu1 %1433  ;;  %1897 = vperm.xlu2 %2530, %v2940_v39  }
 0x48a   : > { %v1442_v61 = vmul.f32 %v1434_v11, %v3188_v5 }
 0x48c   : > { %1452 = vrot.lane.b32.xlu0 %v1442_v61, %s2645_s4  ;;  %v1654_v13 = vpop.permute.xlu2 %1653  ;;  %v1658_v61 = vpop.permute.xlu0 %1657 }
 0x48d   : > { %v1665_v56 = vmul.f32 %v1654_v13, %v3123_v26  ;;  %v1481_v26 = vmul.f32 %v3098_v16, %v3113_v21 }
 0x48f   : > { %1528 = vrot.lane.b32.xlu1 %v1520_v14, %s2647_s26 }
 0x491   : > { %2533 = vset.pattern.permute.xlu2 %v2648_v3  ;;  %v1523_v3 = vmul.f32 %v3154_v44, %v3126_v29 }
 0x492   : > { %v1474_v19 = vpop.permute.xlu1 %1473  ;;  %1845 = vperm.xlu2 %2533, %v2983_v54  }
 0x493   : > { %v1482_v23 = vmul.f32 %v1474_v19, %v3188_v5 }
 0x494   : > { %v3259_v14 = vpop.permute.xlu0 %1697 }
 0x495   : > { %1492 = vrot.lane.b32.xlu0 %v1482_v23, %s2646_s28  ;;  %v1694_v4 = vpop.permute.xlu2 %1693  ;;  %v3272_v23 = vadd.f32 %v3146_v40, %v3079_v7 }
 0x496   : > { %v3209_v6 = vmul.f32 %v1694_v4, %v3203_v24 }
 0x497   : > { %1736 = vrot.lane.b32.xlu1 %v1728_v27, %s2645_s4  ;;  %v3276_v27 = vpop.f32.mrf.mxu0  ;;  %v1586_v60 = vmul.f32 %v1578_v48, %v3272_v23 }
 0x49a   : > { %1592 = vrot.lane.b32.xlu2 %v1584_v28, %s2645_s4  ;;  %v1626_v28 = vmul.f32 %v1618_v10, %v3272_v23 }
 0x49b   : > { %v1514_v54 = vpop.permute.xlu1 %1513 }
 0x49c   : > { %v1522_v33 = vmul.f32 %v1514_v54, %v3188_v5  ;;  %v1726_v44 = vpop.permute.xlu0 %1725 }
 0x49d   : > { %v1731_v10 = vmul.f32 %v1726_v44, %v3171_v53 }
 0x49e   : > { %1532 = vrot.lane.b32.xlu0 %v1522_v33, %s2647_s26  ;;  %v1766_v34 = vpop.permute.xlu2 %1765 }
 0x49f   : > { %1594 = vrot.lane.b32.xlu1 %v1585_v18, %s2645_s4  ;;  %v1771_v29 = vmul.f32 %v1766_v34, %v3171_v53  ;;  %v1391_v18 = vpop.f32.mrf.mxu0  ;;  %v1667_v34 = vmul.f32 %v3157_v46, %v3161_v47 }
 0x4a2   : > { %1632 = vrot.lane.b32.xlu2 %v1624_v37, %s2646_s28 }
 0x4a4   : > { %v3224_v2 = vpop.permute.xlu1 %1553  ;;  %v1758_v54 = vpop.permute.xlu0 %1757 }
 0x4a7   : > { %1634 = vrot.lane.b32.xlu1 %v1625_v45, %s2646_s28  ;;  %v1806_v49 = vpop.permute.xlu2 %1805  ;;  %v1666_v45 = vmul.f32 %v1658_v61, %v3272_v23 }
 0x4a8   : > { %v1811_v40 = vmul.f32 %v1806_v49, %v3171_v53  ;;  %v1769_v49 = vmul.f32 %v1758_v54, %v3203_v24 }
 0x4aa   : > { %1672 = vrot.lane.b32.xlu2 %v1664_v50, %s2647_s26 }
 0x4ac   : > { %v1794_v50 = vpop.permute.xlu0 %1793 }
 0x4ad   : > { %v3232_v58 = vpop.permute.xlu1 %1797 }
 0x4ae   : > { %v1809_v47 = vmul.f32 %v3232_v58, %v3203_v24  ;;  %v1253_v24 = vperm.slane %v3060_v0, 3 }
 0x4af   : > { %1674 = vrot.lane.b32.xlu1 %v1665_v56, %s2647_s26  ;;  %v1394_v56 = vpop.f32.mrf.mxu0 }
 0x4b0   : > { %v3235_v59 = vpop.permute.xlu2 %1753 }
 0x4b2   : > { %1450 = vrot.lane.b32.xlu2 %v1441_v62, %s2645_s4 }
 0x4b6   : > { %v1762_v17 = vpop.permute.xlu1 %1761 }
 0x4b7   : > { %1454 = vrot.lane.b32.xlu1 %v1443_v1, %s2645_s4  ;;  %v1770_v51 = vmul.f32 %v1762_v17, %v3244_v12  ;;  %v1768_v1 = vmul.f32 %v3235_v59, %v3198_v63  ;;  %v1950_v17 = vpop.permute.xlu0 %1949  ;;  %v1397_v61 = vpop.f32.mrf.mxu0 }
 0x4b8   : > { %v3318_v58 = vadd.f32 %v1397_v61, %v1253_v24 }
 0x4b9   : > { %v1722_v11 = vpop.permute.xlu2 %1721 }
 0x4ba   : > { %v1730_v13 = vmul.f32 %v1722_v11, %v3244_v12  ;;  %1490 = vrot.lane.b32.xlu2 %v1481_v26, %s2646_s28  ;;  %v1808_v11 = vmul.f32 %v1794_v50, %v3198_v63 }
 0x4bc   : > { %1740 = vrot.lane.b32.xlu0 %v1730_v13, %s2645_s4 }
 0x4bf   : > { %v1802_v35 = vpop.permute.xlu1 %1801  ;;  %1494 = vrot.lane.b32.xlu1 %v1483_v8, %s2646_s28 }
 0x4c0   : > { %v1810_v41 = vmul.f32 %v1802_v35, %v3244_v12 }
 0x4c2   : > { %1530 = vrot.lane.b32.xlu2 %v1521_v42, %s2647_s26  ;;  %v1870_v16 = vpop.permute.xlu2 %1869  ;;  %v3325_v42 = vadd.f32 %v1394_v56, %v1253_v24 }
 0x4c3   : > { %v1875_v13 = vmul.f32 %v1870_v16, %v3318_v58 }
 0x4c4   : > { %1780 = vrot.lane.b32.xlu0 %v1770_v51, %s2646_s28  ;;  %v1942_v51 = vpop.permute.xlu0 %1941 }
 0x4c7   : > { %1534 = vrot.lane.b32.xlu1 %v1523_v3, %s2647_s26 }
 0x4c8   : > { %v1866_v19 = vpop.permute.xlu1 %1865 }
 0x4c9   : > { %v1874_v3 = vmul.f32 %v1866_v19, %v3325_v42 }
 0x4ca   : > { %1738 = vrot.lane.b32.xlu2 %v1729_v38, %s2645_s4 }
 0x4cb   : > { %v1910_v21 = vpop.permute.xlu2 %1909 }
 0x4cc   : > { %1598 = vrot.lane.b32.xlu0 %v1587_v20, %s2645_s4  ;;  %v1915_v35 = vmul.f32 %v1910_v21, %v3318_v58 }
 0x4cf   : > { %1782 = vrot.lane.b32.xlu1 %v1771_v29, %s2646_s28 }
 0x4d0   : > { %v3280_v4 = vpop.permute.xlu1 %1861 }
 0x4d2   : > { %1596 = vrot.lane.b32.xlu2 %v1586_v60, %s2645_s4 }
 0x4d3   : > { %v1906_v7 = vpop.permute.xlu2 %1905 }
 0x4d4   : > { %1638 = vrot.lane.b32.xlu0 %v1627_v36, %s2646_s28  ;;  %v1914_v44 = vmul.f32 %v1906_v7, %v3325_v42 }
 0x4d7   : > { %1822 = vrot.lane.b32.xlu1 %v1811_v40, %s2647_s26 }
 0x4d8   : > { %v3289_v33 = vpop.permute.xlu1 %1857 }
 0x4da   : > { %1636 = vrot.lane.b32.xlu2 %v1626_v28, %s2646_s28 }
 0x4db   : > { %v3294_v37 = vpop.permute.xlu2 %1901 }
 0x4dc   : > { %1678 = vrot.lane.b32.xlu0 %v1667_v34, %s2647_s26 }
 0x4df   : > { %1820 = vrot.lane.b32.xlu1 %v1810_v41, %s2647_s26 }
 0x4e1   : > { %v1946_v48 = vpop.permute.xlu1 %1945 }
 0x4e2   : > { %1676 = vrot.lane.b32.xlu2 %v1666_v45, %s2647_s26  ;;  %v1954_v36 = vmul.f32 %v1946_v48, %v3325_v42 }
 0x4e3   : > { %v3302_v46 = vpop.permute.xlu2 %1897 }
 0x4e4   : > { %1778 = vrot.lane.b32.xlu0 %v1769_v49, %s2646_s28 }
 0x4e7   : > { %1818 = vrot.lane.b32.xlu1 %v1809_v47, %s2647_s26 }
 0x4e9   : > { %v1938_v62 = vpop.permute.xlu1 %1937 }
 0x4ea   : > { %1742 = vrot.lane.b32.xlu2 %v1731_v10, %s2645_s4 }
 0x4ec   : > { %1776 = vrot.lane.b32.xlu0 %v1768_v1, %s2646_s28  ;;  %v3313_v26 = vpop.permute.xlu2 %1845 }
 0x4ef   : > { %1816 = vrot.lane.b32.xlu1 %v1808_v11, %s2647_s26 }
 0x4f1   : > { %v1449_v53 = vpop.permute.xlu1 %1448 }
 0x4f2   : > { %v1460_v59 = vadd.f32 %v1449_v53, %v3084_v9  ;;  %1841 = vperm.xlu2 %2533, %v2990_v55   ;;  %v1422_v55 = vmul.f32 %v3215_v31, %v3188_v5  ;;  %v1955_v9 = vmul.f32 %v1950_v17, %v3318_v58  ;;  %v3340_v5 = vadd.f32 %v1391_v18, %v1253_v24 }
 0x4f3   : > { %v3351_v18 = vadd.f32 %v3276_v27, %v1253_v24  ;;  %v1562_v27 = vmul.f32 %v3224_v2, %v3272_v23 }
 0x4f4   : > { %v1593_v8 = vpop.permute.xlu2 %1592  ;;  %1886 = vrot.lane.b32.xlu0 %v1875_v13, %s2645_s4  ;;  %v1873_v28 = vmul.f32 %v3280_v4, %v3340_v5  ;;  %v1953_v47 = vmul.f32 %v1942_v51, %v3340_v5 }
 0x4f5   : > { %v1952_v4 = vmul.f32 %v1938_v62, %v3351_v18  ;;  %v1912_v1 = vmul.f32 %v3302_v46, %v3351_v18 }
 0x4f7   : > { %1926 = vrot.lane.b32.xlu1 %v1915_v35, %s2646_s28 }
 0x4f9   : > { %v1489_v0 = vpop.permute.xlu1 %1488 }
 0x4fa   : > { %v1500_v38 = vadd.f32 %v1489_v0, %v1460_v59  ;;  %1837 = vperm.xlu2 %2533, %v2952_v43  }
 0x4fc   : > { %v1633_v16 = vpop.permute.xlu2 %1632  ;;  %1884 = vrot.lane.b32.xlu0 %v1874_v3, %s2645_s4 }
 0x4fe   : > { %v1453_v20 = vpop.permute.xlu0 %1452 }
 0x4ff   : > { %v1462_v21 = vadd.f32 %v1453_v20, %v1422_v55  ;;  %1966 = vrot.lane.b32.xlu1 %v1955_v9, %s2647_s26 }
 0x501   : > { %v1529_v29 = vpop.permute.xlu1 %1528 }
 0x502   : > { %v1540_v60 = vadd.f32 %v1529_v29, %v1500_v38  ;;  %1833 = vperm.xlu2 %2533, %v2940_v39   ;;  %v1704_v39 = vmul.f32 %v3115_v22, %v3198_v63  ;;  %v1872_v22 = vmul.f32 %v3289_v33, %v3351_v18 }
 0x504   : > { %v1564_v43 = vadd.f32 %v3096_v15, %v1540_v60  ;;  %v1673_v19 = vpop.permute.xlu2 %1672  ;;  %1924 = vrot.lane.b32.xlu0 %v1914_v44, %s2646_s28  ;;  %v1913_v15 = vmul.f32 %v3294_v37, %v3340_v5  ;;  %v1706_v44 = vmul.f32 %v3259_v14, %v3244_v12 }
 0x506   : > { %v1604_v31 = vadd.f32 %v1593_v8, %v1564_v43  ;;  %v1976_v43 = vld [vmem:[%s2809_s0] sm:$0xff] }
 0x507   : > { %v1493_v40 = vpop.permute.xlu0 %1492  ;;  %1964 = vrot.lane.b32.xlu1 %v1954_v36, %s2647_s26 }
 0x508   : > { %v1644_v7 = vadd.f32 %v1633_v16, %v1604_v31  ;;  %v1502_v54 = vadd.f32 %v1493_v40, %v1462_v21  ;;  %v1977_v31 = vld [vmem:[%s2809_s0 + $0x8] sm:$0xff] }
 0x509   : > { %v1737_v34 = vpop.permute.xlu1 %1736 }
 0x50a   : > { %v1684_v41 = vadd.f32 %v1673_v19, %v1644_v7  ;;  %1882 = vrot.lane.b32.xlu2 %v1873_v28, %s2645_s4 }
 0x50c   : > { %v1708_v45 = vadd.f32 %v1704_v39, %v1684_v41  ;;  %v1451_v48 = vpop.permute.xlu2 %1450  ;;  %1922 = vrot.lane.b32.xlu0 %v1913_v15, %s2646_s28  ;;  %v1978_v39 = vld [vmem:[%s2809_s0 + $0x10] sm:$0xff] }
 0x50d   : > { %v1461_v49 = vadd.f32 %v1451_v48, %v3120_v25  ;;  %v1979_v48 = vld [vmem:[%s2809_s0 + $0x18] sm:$0xff] }
 0x50e   : > { %v3356_v50 = vadd.f32 %v1737_v34, %v1708_v45 }
 0x50f   : > { %1960 = vrot.lane.b32.xlu1 %v1952_v4, %s2647_s26 }
 0x510   : > { %v1533_v63 = vpop.permute.xlu0 %1532 }
 0x511   : > { %v1542_v37 = vadd.f32 %v1533_v63, %v1502_v54  ;;  %v1595_v56 = vpop.permute.xlu1 %1594 }
 0x512   : > { %1880 = vrot.lane.b32.xlu2 %v1872_v22, %s2645_s4  ;;  %v1851_v22 = vmul.f32 %v3313_v26, %v3318_v58 }
 0x513   : > { %v1566_v10 = vadd.f32 %v1562_v27, %v1542_v37 }
 0x514   : > { %v1491_v62 = vpop.permute.xlu2 %1490  ;;  %1962 = vrot.lane.b32.xlu0 %v1953_v47, %s2647_s26 }
 0x515   : > { %v1501_v25 = vadd.f32 %v1491_v62, %v1461_v49 }
 0x519   : > { %v1635_v17 = vpop.permute.xlu1 %1634 }
 0x51a   : > { %1920 = vrot.lane.b32.xlu2 %v1912_v1, %s2646_s28  ;;  %s3520_s28 = sld [smem:[#allocation17_spill]] (!%p2354_p11) }
 0x51c   : > { %v1531_v33 = vpop.permute.xlu2 %1530 }
 0x51d   : > { %v1541_v11 = vadd.f32 %v1531_v33, %v1501_v25 }
 0x51f   : > { %v1565_v2 = vadd.f32 %v3129_v30, %v1541_v11 }
 0x521   : > { %v1675_v23 = vpop.permute.xlu1 %1674  ;;  %v1605_v61 = vadd.f32 %v1595_v56, %v1565_v2 }
 0x523   : > { %v1645_v24 = vadd.f32 %v1635_v17, %v1605_v61 }
 0x524   : > { %v1739_v53 = vpop.permute.xlu2 %1738 }
 0x525   : > { %v1685_v13 = vadd.f32 %v1675_v23, %v1645_v24 }
 0x527   : > { %v1709_v59 = vadd.f32 %v3209_v6, %v1685_v13 }
 0x529   : > { %v3371_v8 = vadd.f32 %v1739_v53, %v1709_v59  ;;  %v1455_v35 = vpop.permute.xlu1 %1454 }
 0x52a   : > { %v1463_v38 = vadd.f32 %v1455_v35, %v3132_v32 }
 0x52c   : > { %v1597_v51 = vpop.permute.xlu2 %1596 }
 0x52d   : > { %v1606_v55 = vadd.f32 %v1597_v51, %v1566_v10 }
 0x52e   : > { %v1741_v46 = vpop.permute.xlu0 %1740 }
 0x531   : > { %v1495_v0 = vpop.permute.xlu1 %1494 }
 0x532   : > { %v1503_v30 = vadd.f32 %v1495_v0, %v1463_v38 }
 0x534   : > { %v1637_v3 = vpop.permute.xlu2 %1636 }
 0x535   : > { %v1646_v21 = vadd.f32 %v1637_v3, %v1606_v55 }
 0x536   : > { %v1781_v16 = vpop.permute.xlu0 %1780 }
 0x539   : > { %v1535_v9 = vpop.permute.xlu1 %1534 }
 0x53a   : > { %v1543_v20 = vadd.f32 %v1535_v9, %v1503_v30 }
 0x53c   : > { %v1677_v29 = vpop.permute.xlu2 %1676  ;;  %v1567_v6 = vadd.f32 %v3168_v52, %v1543_v20 }
 0x53d   : > { %v1686_v60 = vadd.f32 %v1677_v29, %v1646_v21 }
 0x53e   : > { %v1599_v19 = vpop.permute.xlu0 %1598 }
 0x53f   : > { %v1710_v36 = vadd.f32 %v1706_v44, %v1686_v60  ;;  %v1607_v54 = vadd.f32 %v1599_v19, %v1567_v6 }
 0x540   : > { %1980 = vxpose.xlu2.b32.start [1/4] (short) (narrow) %v1976_v43, 16 }
 0x541   : > { %v1783_v32 = vpop.permute.xlu1 %1782  ;;  %v1750_v1 = vadd.f32 %v1741_v46, %v1710_v36 }
 0x543   : > { %v1790_v33 = vadd.f32 %v1781_v16, %v1750_v1 }
 0x544   : > { %v1743_v28 = vpop.permute.xlu2 %1742 }
 0x546   : > { %v1639_v40 = vpop.permute.xlu0 %1638 }
 0x547   : > { %v1647_v34 = vadd.f32 %v1639_v40, %v1607_v54 }
 0x548   : > { %1981 = vxpose.xlu2.b32.cont [2/4] (short) (narrow) %v1977_v31, 16 }
 0x549   : > { %v1823_v7 = vpop.permute.xlu1 %1822 }
 0x54c   : > { %v1842_v41 = vpop.permute.xlu2 %1841 }
 0x54d   : > { %v1850_v24 = vmul.f32 %v1842_v41, %v3325_v42 }
 0x54e   : > { %v1679_v15 = vpop.permute.xlu0 %1678 }
 0x54f   : > { %v1687_v52 = vadd.f32 %v1679_v15, %v1647_v34 }
 0x550   : > { %1982 = vxpose.xlu2.b32.cont [3/4] (short) (narrow) %v1978_v39, 16 }
 0x551   : > { %v1711_v12 = vadd.f32 %v3175_v57, %v1687_v52  ;;  %v1821_v14 = vpop.permute.xlu1 %1820 }
 0x552   : > { %v1830_v2 = vadd.f32 %v1821_v14, %v1790_v33 }
 0x553   : > { %v1751_v45 = vadd.f32 %v1743_v28, %v1711_v12  ;;  %v1195_v28 = vld [vmem:[#allocation3 + $0x8] sm:$0xff] }
 0x554   : > { %v1838_v56 = vpop.permute.xlu2 %1837  ;;  %v1854_v53 = vadd.f32 %v1850_v24, %v1830_v2 }
 0x555   : > { %v1791_v4 = vadd.f32 %v1783_v32, %v1751_v45  ;;  %v1849_v55 = vmul.f32 %v1838_v56, %v3340_v5 }
 0x556   : > { %v1779_v49 = vpop.permute.xlu0 %1778 }
 0x557   : > { %v1831_v63 = vadd.f32 %v1823_v7, %v1791_v4  ;;  %v1789_v51 = vadd.f32 %v1779_v49, %v3371_v8 }
 0x558   : > { %1983 = vxpose.xlu2.b32.end [4/4] (short) (narrow) %v1979_v48, 16 }
 0x559   : > { %v1819_v27 = vpop.permute.xlu1 %1818  ;;  %v1855_v37 = vadd.f32 %v1851_v22, %v1831_v63 }
 0x55a   : > { %v1829_v16 = vadd.f32 %v1819_v27, %v1789_v51 }
 0x55c   : > { %v1834_v62 = vpop.permute.xlu2 %1833  ;;  %v1853_v20 = vadd.f32 %v1849_v55, %v1829_v16 }
 0x55d   : > { %v1848_v9 = vmul.f32 %v1834_v62, %v3351_v18  ;;  %v1194_v18 = vld [vmem:[#allocation3] sm:$0xff] }
 0x55e   : > { %v1777_v47 = vpop.permute.xlu0 %1776 }
 0x55f   : > { %v1788_v38 = vadd.f32 %v1777_v47, %v3356_v50 }
 0x561   : > { %v1817_v10 = vpop.permute.xlu1 %1816 }
 0x562   : > { %v1828_v42 = vadd.f32 %v1817_v10, %v1788_v38 }
 0x564   : > { %v1883_v23 = vpop.permute.xlu2 %1882  ;;  %v1852_v29 = vadd.f32 %v1848_v9, %v1828_v42 }
 0x565   : > { %v1893_v21 = vadd.f32 %v1883_v23, %v1853_v20 }
 0x566   : > { %v1887_v25 = vpop.permute.xlu0 %1886 }
 0x567   : > { %v1895_v17 = vadd.f32 %v1887_v25, %v1855_v37 }
 0x569   : > { %v1927_v57 = vpop.permute.xlu1 %1926 }
 0x56a   : > { %v1935_v61 = vadd.f32 %v1927_v57, %v1895_v17 }
 0x56c   : > { %v1881_v46 = vpop.permute.xlu2 %1880 }
 0x56d   : > { %v1892_v44 = vadd.f32 %v1881_v46, %v1852_v29 }
 0x56e   : > { %v1885_v11 = vpop.permute.xlu0 %1884 }
 0x56f   : > { %v1894_v13 = vadd.f32 %v1885_v11, %v1854_v53 }
 0x571   : > { %v1967_v26 = vpop.permute.xlu1 %1966 }
 0x572   : > { %v1975_v58 = vadd.f32 %v1967_v26, %v1935_v61 }
 0x574   : > { %2031 = vmatpush.msrb.mxu1 %v1975_v58  ;;  %v1921_v6 = vpop.permute.xlu2 %1920 }
 0x575   : > { %v1932_v19 = vadd.f32 %v1921_v6, %v1892_v44 }
 0x576   : > { %v1925_v59 = vpop.permute.xlu0 %1924 }
 0x577   : > { %v1934_v35 = vadd.f32 %v1925_v59, %v1894_v13 }
 0x579   : > { %v1965_v0 = vpop.permute.xlu1 %1964 }
 0x57a   : > { %v1974_v3 = vadd.f32 %v1965_v0, %v1934_v35 }
 0x57c   : > { %2032 = vmatpush.msrb.mxu1 %v1974_v3 }
 0x57e   : > { %v1923_v30 = vpop.permute.xlu0 %1922 }
 0x57f   : > { %v1933_v60 = vadd.f32 %v1923_v30, %v1893_v21 }
 0x581   : > { %v1961_v8 = vpop.permute.xlu1 %1960 }
 0x582   : > { %v1972_v32 = vadd.f32 %v1961_v8, %v1932_v19 }
 0x586   : > { %v1963_v43 = vpop.permute.xlu0 %1962 }
 0x587   : > { %v1973_v36 = vadd.f32 %v1963_v43, %v1933_v60 }
 0x589   : > { %2033 = vmatpush.msrb.mxu1 %v1973_v36 }
 0x58b   : > { %2034 = vmatpush.msrb.mxu1 %v1972_v32 }
 0x5d9   : > { %v1996_v50 = vpop.trf.xlu2 }
 0x5da   : > { %2352 = vmatmul.msk.f32.vlgmr.msrb.gmra.mxu1 %vm2012_vm13, %v1996_v50 }
 0x5e1   : > { %v1997_v5 = vpop.trf.xlu2 }
 0x5e2   : > { %2353 = vmatmul.msk.f32.gmra.mxu1 %vm2012_vm13, %v1997_v5 }
 0x657   : > { %v2036_v31 = vpop.f32.mrf.mxu1 }
 0x658   : > { %v2042_v40 = vadd.f32 %v2036_v31, %v1194_v18 }
 0x65a   : > { %2044 = vst.msk [vmem:[#allocation3] sm:$0xff] %vm2012_vm13, %v2042_v40 }
 0x65e   : > { %2049 = sbr.rel (%p2354_p11) target bundleno = 2455 (0x997), region = 128 }
 0x65f   : > { %v2039_v7 = vpop.f32.mrf.mxu1 }
 0x660   : > { %v2043_v54 = vadd.f32 %v2039_v7, %v1195_v28 }
 0x662   : > { %2045 = vst.msk [vmem:[#allocation3 + $0x8] sm:$0xff] %vm2012_vm13, %v2043_v54 }
 0x663   : > { %v2055_v34 = vld [vmem:[%s3490_s15 + $0x8] sm:$0xff]  ;;  %v2054_v39 = vld [vmem:[%s3490_s15] sm:$0xff]  ;;  %v2130_v12 = vld [vmem:[%s3492_s17 + $0x18] sm:$0xff]  ;;  %vm2175_vm0 = vcmask 523264   ;;  %vm2199_vm2 = vcmask 25600  }
 0x664   : > { %2076 = vmatpush.msra.mxu0 %v2055_v34  ;;  %v2052_v15 = vld [vmem:[#allocation4] sm:$0xff]  ;;  %v2053_v52 = vld [vmem:[#allocation4 + $0x8] sm:$0xff]  ;;  %v2129_v14 = vld [vmem:[%s3492_s17 + $0x10] sm:$0xff]  ;;  %2150 = vmatpush.msra.mxu2 %v2130_v12 }
 0x665   : > { %v2050_v41 = vld [vmem:[#allocation3] sm:$0xff]  ;;  %v2128_v45 = vld [vmem:[%s3492_s17 + $0x8] sm:$0xff]  ;;  %v2536_v49 = vld [vmem:[%s3491_s16] ss:$0 sm:$0xff] }
 0x666   : > { %2077 = vmatpush.msra.mxu0 %v2054_v39  ;;  %2151 = vmatpush.msra.mxu2 %v2129_v14  ;;  %v2103_v33 = vld [vmem:[%s3520_s28] sm:$0x3]  ;;  %v2170_v61 = vld [vmem:[%s3494_s19 + $0x38] sm:$0xff]  ;;  %v2169_v24 = vld [vmem:[%s3494_s19 + $0x30] sm:$0xff] }
 0x667   : > { %2355 = vmatmul.msk.f32.vlgmr.msra.gmra.mxu0 %vm1152_vm10, %v2052_v15  ;;  %v2127_v2 = vld [vmem:[%s3492_s17] sm:$0xff]  ;;  %2187 = vmatpush.msra.mxu3 %v2170_v61  ;;  %v2168_v26 = vld [vmem:[%s3494_s19 + $0x28] sm:$0xff]  ;;  %v2166_v53 = vld [vmem:[%s3494_s19 + $0x18] sm:$0xff] }
 0x668   : > { %2152 = vmatpush.msra.mxu2 %v2128_v45  ;;  %v2167_v58 = vld [vmem:[%s3494_s19 + $0x20] sm:$0xff]  ;;  %v2165_v13 = vld [vmem:[%s3494_s19 + $0x10] sm:$0xff]  ;;  %v2164_v59 = vld [vmem:[%s3494_s19 + $0x8] sm:$0xff] }
 0x669   : > { %v2051_v63 = vld [vmem:[#allocation3 + $0x8] sm:$0xff]  ;;  %2188 = vmatpush.msra.mxu3 %v2169_v24  ;;  %v2163_v35 = vld [vmem:[%s3494_s19] sm:$0xff] }
 0x66a   : > { %2153 = vmatpush.msra.mxu2 %v2127_v2  ;;  %v2537_v51 = vld [vmem:[%s3493_s18] ss:$0 sm:$0xff] }
 0x66b   : > { %2189 = vmatpush.msra.mxu3 %v2168_v26  ;;  %v2538_v55 = vld [vmem:[%s3495_s20] ss:$0 sm:$0xff] }
 0x66d   : > { %2190 = vmatpush.msra.mxu3 %v2167_v58 }
 0x66f   : > { %2356 = vmatmul.msk.f32.gmra.mxu0 %vm1152_vm10, %v2053_v52  ;;  %2191 = vmatpush.msra.mxu3 %v2166_v53 }
 0x671   : > { %2192 = vmatpush.msra.mxu3 %v2165_v13 }
 0x673   : > { %2193 = vmatpush.msra.mxu3 %v2164_v59 }
 0x675   : > { %2194 = vmatpush.msra.mxu3 %v2163_v35 }
 0x6e4   : > { %v2079_v48 = vpop.f32.mrf.mxu0 }
 0x6e5   : > { %v2085_v4 = vadd.f32 %v2079_v48, %v2050_v41 }
 0x6e7   : > { %v2091_v22 = vadd.f32 %v2536_v49, %v2085_v4 }
 0x6e9   : > { %v2095_v37 = vmul.f32 1.442695, %v2091_v22  ;;  %vm2093_vm15 = vcmp.gt.f32.partialorder %v2091_v22, 0.0 }
 0x6eb   : > { %2539 = vpow2.f32 %v2095_v37 }
 0x6ec   : > { %v2082_v27 = vpop.f32.mrf.mxu0 }
 0x6ed   : > { %v2086_v56 = vadd.f32 %v2082_v27, %v2051_v63 }
 0x6ef   : > { %v2092_v47 = vadd.f32 %v2536_v49, %v2086_v56 }
 0x6f1   : > { %v2097_v10 = vmul.f32 1.442695, %v2092_v47  ;;  %v2540_v62 = vpop.eup %2539  ;;  %vm2094_vm14 = vcmp.gt.f32.partialorder %v2092_v47, 0.0 }
 0x6f2   : > { %v2357_v57 = vadd.f32 -1.0, %v2540_v62 }
 0x6f3   : > { %2541 = vpow2.f32 %v2097_v10 }
 0x6f4   : > { %v2101_v11 = vsel %vm2093_vm15, %v2091_v22, %v2357_v57 }
 0x6f9   : > { %v2542_v25 = vpop.eup %2541 }
 0x6fa   : > { %v2358_v1 = vadd.f32 -1.0, %v2542_v25 }
 0x6fc   : > { %v2102_v17 = vsel %vm2094_vm14, %v2092_v47, %v2358_v1 }
 0x6fd   : > { %2121 = vmatpush.msra.mxu1 %v2102_v17 }
 0x6ff   : > { %2122 = vmatpush.msra.mxu1 %v2101_v11 }
 0x700   : > { %2359 = vmatmul.msk.f32.vlgmr.msra.gmra.mxu1 %vm1152_vm10, %v2103_v33 }
 0x77d   : > { %v2124_v23 = vpop.f32.mrf.mxu1 }
 0x77e   : > { %2360 = vmatmul.msk.f32.vlgmr.msra.gmra.mxu2 %vm2012_vm13, %v2124_v23 }
 0x801   : > { %v2155_v0 = vpop.f32.mrf.mxu2 }
 0x802   : > { %v2156_v46 = vadd.f32 %v2537_v51, %v2155_v0 }
 0x804   : > { %v2159_v3 = vmul.f32 1.442695, %v2156_v46  ;;  %vm2158_vm1 = vcmp.gt.f32.partialorder %v2156_v46, 0.0 }
 0x806   : > { %2543 = vpow2.f32 %v2159_v3 }
 0x80c   : > { %v2544_v38 = vpop.eup %2543 }
 0x80d   : > { %v2361_v16 = vadd.f32 -1.0, %v2544_v38 }
 0x80f   : > { %v2162_v30 = vsel %vm2158_vm1, %v2156_v46, %v2361_v16 }
 0x810   : > { %2362 = vmatmul.msk.f32.vlgmr.msra.gmra.mxu3 %vm2175_vm0, %v2162_v30 }
 0x893   : > { %v2196_v42 = vpop.f32.mrf.mxu3 }
 0x894   : > { %v2197_v9 = vadd.f32 %v2538_v55, %v2196_v42 }
 0x896   : > { %v2200_v20 = vsel %vm2199_vm2, %v2197_v9, -inf }
 0x897   : > { %2201 = vmax.xlane.f32.xlu0 %v2200_v20 }
 0x90a   : > { %v2202_v21 = vpop.xlane.xlu0 %2201 }
 0x90b   : > { %v2203_v29 = vsub.f32 %v2197_v9, %v2202_v21 }
 0x90d   : > { %v2204_v6 = vmul.f32 1.442695, %v2203_v29 }
 0x90f   : > { %2545 = vpow2.f32 %v2204_v6 }
 0x915   : > { %v2546_v44 = vpop.eup %2545 }
 0x916   : > { %v2206_v60 = vsel %vm2199_vm2, %v2546_v44, 0.0 }
 0x917   : > { %2207 = vadd.xlane.f32.xlu0 %v2206_v60 }
 0x98a   : > { %v2208_v8 = vpop.xlane.xlu0 %2207 }
 0x98b   : > { %2547 = vlog2.f32 %v2208_v8 }
 0x991   : > { %v2548_v43 = vpop.eup %2547 }
 0x992   : > { %v2210_v19 = vmul.f32 0.6931472, %v2548_v43 }
 0x994   : > { %v2211_v36 = vsub.f32 %v2203_v29, %v2210_v19 }
 0x996   : > { %2212 = vst.msk [vmem:[#allocation5] sm:$0x3] %vm2199_vm2, %v2211_v36 }
 0x997 PF: > { %s3521_s30 = sld [smem:[#allocation10_spill]]  ;;  %s2649_s29 = smov [#allocation5]  }
 0x998   : > { %s3523_s23 = sld [smem:[#allocation19_spill]]  ;;  %s2219_s1 = sshll.u32 %s2649_s29, 4  ;;  %s2220_s1 = int_to_ptr.vmem [resolvable:$true] %s2219_s1 }
 0x99d   : > { %s3522_s2 = sadd.s32 4294967295, %s3521_s30  }
 0x99e   : > { %p2380_p12 = scmp.eq.s32.totalorder %s3522_s2, 3  ;;  %s2221_s24 = sshll.u32 %s3523_s23, 4  ;;  %s2222_s24 = int_to_ptr.hbm [resolvable:$true] %s2221_s24 }
 0x9a0   : > { %2377 = dma.vmem_to_hbm [thread:$0]  (%p2380_p12), %s2220_s1, 32, %s2222_s24, [#allocation6]  }
 0x9a1   : > { %2598 = dma.done.wait (%p2380_p12), [#allocation6], 32  }
 0x9a2   : > { %2600 = vsyncadd (%p2380_p12), [#allocation6], 4294967264 }
 0x9a3 PF: > { %s3524_s4 = sld [smem:[#allocation10_spill]] }
 0x9a4   : > { %s3525_s2 = sld [smem:[#allocation8_spill]] }
 0x9a5   : > { %s3526_s25 = sld [smem:[#allocation9_spill]] }
 0x9a6   : > { %s3527_s26 = sld [smem:[#allocation11_spill]] }
 0x9a7   : > { %s3528_s27 = sld [smem:[#allocation12_spill]] }
 0x9a9   : > { %s32_s3 = sadd.s32 1, %s3524_s4  }
 0x9aa   : > { %p29_p13 = scmp.ge.s32.totalorder %s32_s3, 6  }
 0x9ac   :  { %31 = sbr.rel (!%p29_p13) target bundleno = 11 (0xb), region = 161 }
 0x9b1   :  { %2235 = vsyncpa [#allocation6], 1 }
 0x9b2   :  { %2237 = vsyncpa [#allocation6 + $0x1], 1 }

</bundles_post_ra>
